<compile_context>
chip_gen: v6e
topology: v6e:2x2x1
jax: 0.10.0
libtpu: 0.0.40
codegen_flags: <defaults>
</compile_context>

<pallas_src>
import functools

import jax
import jax.numpy as jnp
from jax.experimental import pallas as pl
from jax.experimental.pallas import tpu as pltpu

# --- module hyper-parameters --------------------------------------------------
INPUT_FEAT_DIM = 16
D = 4
W_LIST = [32, 64, 32, 32, 8]          # out_dim of layers 0..D
N_FREQ = -1                           # -> identity embedder
SKIPS = []                            # -> no concat in forward
# TODO(synk): positional embedder (n_freq >= 0) and skip concatenation are not
# implemented since the module defaults (n_freq=-1, skips=[]) disable them.

OUT_DIM = W_LIST[-1]
NUM_LAYERS = D + 1
LAYER_DIMS = []                        # (in_dim, out_dim) per layer
_in = INPUT_FEAT_DIM
for _out in W_LIST:
    LAYER_DIMS.append((_in, _out))
    _in = _out
MAXD = max(max(i, o) for i, o in LAYER_DIMS)   # 64 -> padded packed param slabs


def _round_up(x, m):
    return ((x + m - 1) // m) * m


def _default_bf16_act():
    """bf16 elementwise / inter-layer hand-off only on chips with a bf16 VPU."""
    try:
        kind = jax.devices()[0].device_kind.lower()
    except Exception:
        return False
    return ("v6" in kind) or ("v7" in kind)


def _choose_tile(n, tile_n):
    """Pick a row tile (multiple of 128) and padded N.

    Keeps the grid at >= 2 steps when N allows it (v7x megacore sharding needs
    at least 2 steps) and balances the tile so the last step isn't mostly padding.
    """
    tile_n = max(128, _round_up(tile_n, 128))
    n128 = _round_up(max(n, 1), 128)
    tile = min(tile_n, n128)
    if tile > 128 and n128 // tile < 2:
        tile = max(128, _round_up(tile // 2, 128))
    steps = pl.cdiv(n128, tile)
    tile = max(128, _round_up(pl.cdiv(n128, steps), 128))
    n_pad = _round_up(n, tile)
    return tile, n_pad


# --- kernel ---------------------------------------------------------------------
def _mlp_kernel(x_ref, w_ref, b_ref, out_ref, *, bf16_act):
    """Full SemanticDecoder forward for one row tile, batch on the lane axis.

    x_ref:   [INPUT_FEAT_DIM, tile] f32   (lane-dense input slab)
    w_ref:   [NUM_LAYERS, MAXD, MAXD] bf16 (zero-padded outside each layer's region)
    b_ref:   [NUM_LAYERS, MAXD, 1]    f32  (zero-padded)
    out_ref: [OUT_DIM, tile]          f32  (lane-dense output slab)
    """
    x = x_ref[...].astype(jnp.bfloat16)                    # [16, tile] bf16 MXU operand

    def bias_relu(acc, b):
        if bf16_act:   # v6e / v7x: bf16 VPU path, halves elementwise traffic + scratch
            return jnp.maximum(acc.astype(jnp.bfloat16) + b.astype(jnp.bfloat16), 0.0)
        return jnp.maximum(acc + b, 0.0)                   # v5e: f32 VPU path

    # Layer 0: only the :16 input columns of the padded slab are sliced.
    acc = jnp.dot(w_ref[0, :, :INPUT_FEAT_DIM], x, preferred_element_type=jnp.float32)
    h = bias_relu(acc, b_ref[0])                           # [MAXD, tile]

    # Hidden layers 1..D-1: full padded [MAXD, MAXD] matmuls (zero padding is exact).
    for l in range(1, D):
        acc = jnp.dot(w_ref[l], h.astype(jnp.bfloat16), preferred_element_type=jnp.float32)
        h = bias_relu(acc, b_ref[l])

    # Layer D: plain Linear (no ReLU); bias-add in f32, slice only the valid rows.
    acc = jnp.dot(w_ref[D], h.astype(jnp.bfloat16), preferred_element_type=jnp.float32)
    out_ref[...] = (acc + b_ref[D])[:OUT_DIM, :].astype(out_ref.dtype)


# --- wrappers --------------------------------------------------------------------
@functools.partial(jax.jit, static_argnames=("tile_n", "bf16_act"))
def _forward_lane_dense_impl(feat, w_packed, b_packed, tile_n, bf16_act):
    n, c_in = feat.shape
    assert c_in == INPUT_FEAT_DIM
    tile, n_pad = _choose_tile(n, tile_n)

    feat_t = feat.T                                        # [16, N] lane-dense input
    if n_pad != n:
        feat_t = jnp.pad(feat_t, ((0, 0), (0, n_pad - n)))

    # Explicit scoped-VMEM limit: v5e's default is only 16 MiB; cap at 64 MiB
    # (v7x physical) so a tile that compiles on v6e also fits on v7x.
    vmem_limit = int(min(64 << 20, max(32 << 20, 1024 * tile + (4 << 20))))

    kernel = functools.partial(_mlp_kernel, bf16_act=bf16_act)
    out_t = pl.pallas_call(
        kernel,
        out_shape=jax.ShapeDtypeStruct((OUT_DIM, n_pad), jnp.float32),
        grid_spec=pltpu.PrefetchScalarGridSpec(
            num_scalar_prefetch=0,
            grid=(n_pad // tile,),
            in_specs=[
                pl.BlockSpec((INPUT_FEAT_DIM, tile), lambda i: (0, i)),
                pl.BlockSpec((NUM_LAYERS, MAXD, MAXD), lambda i: (0, 0, 0)),
                pl.BlockSpec((NUM_LAYERS, MAXD, 1), lambda i: (0, 0, 0)),
            ],
            out_specs=pl.BlockSpec((OUT_DIM, tile), lambda i: (0, i)),
        ),
        compiler_params=pltpu.CompilerParams(
            dimension_semantics=("parallel",),
            vmem_limit_bytes=vmem_limit),
    )(feat_t, w_packed, b_packed)

    return out_t[:, :n]                                    # [OUT_DIM, N]


def semantic_decoder_forward_lane_dense(feat, w_packed, b_packed, *,
                                        tile_n=8192, bf16_act=None):
    """Preferred entry point: returns [OUT_DIM, N] (no extra HBM transpose pass)."""
    if bf16_act is None:
        bf16_act = _default_bf16_act()
    return _forward_lane_dense_impl(feat, w_packed, b_packed, tile_n, bf16_act)


def semantic_decoder_forward(feat, w_packed, b_packed, *, tile_n=8192, bf16_act=None):
    """Module-compatible layout: feat [N, 16] f32 -> [N, OUT_DIM] f32.

    Note: the trailing .T is one extra XLA HBM pass; consumers that can accept
    [OUT_DIM, N] should use semantic_decoder_forward_lane_dense instead.
    """
    return semantic_decoder_forward_lane_dense(
        feat, w_packed, b_packed, tile_n=tile_n, bf16_act=bf16_act).T


# --- parameters ----------------------------------------------------------------
def init_params(key, input_feat_dim=INPUT_FEAT_DIM, w_list=W_LIST):
    """Torch-nn.Linear-style synthetic params: weights [out, in], biases [out]."""
    ws, bs = [], []
    in_dim = input_feat_dim
    for out_dim in w_list:
        key, kw, kb = jax.random.split(key, 3)
        bound = float(in_dim) ** -0.5
        ws.append(jax.random.uniform(kw, (out_dim, in_dim), jnp.float32, -bound, bound))
        bs.append(jax.random.uniform(kb, (out_dim,), jnp.float32, -bound, bound))
        in_dim = out_dim
    return ws, bs


def pack_params(ws, bs):
    """Pack per-layer params into two VMEM-resident slabs (weights cast to bf16).

    Zero padding outside each layer's valid [out, in] region keeps the padded
    [MAXD, MAXD] matmuls bit-exact.
    """
    wp = jnp.zeros((NUM_LAYERS, MAXD, MAXD), jnp.float32)
    bp = jnp.zeros((NUM_LAYERS, MAXD, 1), jnp.float32)
    for l, (w, b) in enumerate(zip(ws, bs)):
        o, i = w.shape
        wp = wp.at[l, :o, :i].set(w)
        bp = bp.at[l, :o, 0].set(b)
    return wp.astype(jnp.bfloat16), bp


# --- references ------------------------------------------------------------------
def _reference_forward_f32(feat, ws, bs):
    """Plain-JAX f32 reference matching the PyTorch forward exactly."""
    h = feat
    for l, (w, b) in enumerate(zip(ws, bs)):
        h = h @ w.T + b
        if l != D:
            h = jnp.maximum(h, 0.0)
    return h


def _reference_forward_bf16(feat, ws, bs):
    """Reference with bf16 matmul operands + f32 accumulation (kernel-like numerics)."""
    h = feat
    for l, (w, b) in enumerate(zip(ws, bs)):
        h = jax.lax.dot_general(
            h.astype(jnp.bfloat16), w.astype(jnp.bfloat16),
            (((1,), (1,)), ((), ())), preferred_element_type=jnp.float32) + b
        if l != D:
            h = jnp.maximum(h, 0.0)
    return h


if __name__ == "__main__":
    key = jax.random.PRNGKey(0)
    key, k_feat = jax.random.split(key)

    N = 1000        # not a multiple of 128: exercises padding + a 2-step grid
    feat = jax.random.normal(k_feat, (N, INPUT_FEAT_DIM), jnp.float32)

    ws, bs = init_params(key)
    w_packed, b_packed = pack_params(ws, bs)

    # Lane-dense output (preferred consumer layout, no extra HBM transpose pass).
    out_ld = semantic_decoder_forward_lane_dense(feat, w_packed, b_packed)
    out_ld = jax.block_until_ready(out_ld)
    assert out_ld.shape == (OUT_DIM, N)

    # Module-compatible [N, OUT_DIM] layout.
    out = semantic_decoder_forward(feat, w_packed, b_packed)
    out = jax.block_until_ready(out)
    assert out.shape == (N, OUT_DIM)

    ref_bf16 = _reference_forward_bf16(feat, ws, bs)   # kernel-like numerics
    ref_f32 = _reference_forward_f32(feat, ws, bs)     # exact module semantics (f32)

    assert bool(jnp.allclose(out_ld, ref_bf16.T, atol=3e-2, rtol=3e-2)), \
        "lane-dense output mismatch vs bf16 reference"
    assert bool(jnp.allclose(out, ref_bf16, atol=3e-2, rtol=3e-2)), \
        "mismatch vs bf16 reference"
    assert bool(jnp.allclose(out, ref_f32, atol=7e-2, rtol=7e-2)), \
        "mismatch vs f32 reference"

    print("KERNEL_OK")
</pallas_src>

<mosaic_0001>
module attributes {stable_mosaic.version = 11 : i64} {
  func.func @_mlp_kernel(%arg0: i32, %arg1: memref<16x512xf32, #tpu.memory_space<vmem>>, %arg2: memref<5x64x64xbf16, #tpu.memory_space<vmem>>, %arg3: memref<5x64x1xf32, #tpu.memory_space<vmem>>, %arg4: memref<8x512xf32, #tpu.memory_space<vmem>>) attributes {dimension_semantics = [#tpu.dimension_semantics<parallel>], iteration_bounds = array<i64: 2>, scalar_prefetch = 0 : i64, scratch_operands = 0 : i64, tpu.core_type = #tpu.core_type<tc>, window_params = [{transform_indices = @transform_0, window_bounds = array<i64: 16, 512>}, {pipeline_mode = #tpu.pipeline_mode<synchronous>, transform_indices = @transform_1, window_bounds = array<i64: 5, 64, 64>}, {pipeline_mode = #tpu.pipeline_mode<synchronous>, transform_indices = @transform_2, window_bounds = array<i64: 5, 64, 1>}, {transform_indices = @transform_3, window_bounds = array<i64: 8, 512>}]} {
    %c0 = arith.constant 0 : index
    %c0_0 = arith.constant 0 : index
    %0 = vector.load %arg1[%c0, %c0_0] : memref<16x512xf32, #tpu.memory_space<vmem>>, vector<16x512xf32>
    %1 = arith.truncf %0 : vector<16x512xf32> to vector<16x512xbf16>
    %c0_1 = arith.constant 0 : index
    %c0_2 = arith.constant 0 : index
    %c0_3 = arith.constant 0 : index
    %2 = vector.load %arg2[%c0_1, %c0_2, %c0_3] : memref<5x64x64xbf16, #tpu.memory_space<vmem>>, vector<1x64x16xbf16>
    %3 = vector.shape_cast %2 : vector<1x64x16xbf16> to vector<64x16xbf16>
    %cst = arith.constant dense<0.000000e+00> : vector<64x512xf32>
    %4 = tpu.matmul %3, %1, %cst {dimension_numbers = #tpu.dot_dimension_numbers<[1], [0], [0], [1], [0, 0, 1, 1], [], []>} : vector<64x16xbf16>, vector<16x512xbf16>, vector<64x512xf32> -> vector<64x512xf32>
    %c0_4 = arith.constant 0 : index
    %c0_5 = arith.constant 0 : index
    %c0_6 = arith.constant 0 : index
    %5 = vector.load %arg3[%c0_4, %c0_5, %c0_6] : memref<5x64x1xf32, #tpu.memory_space<vmem>>, vector<1x64x1xf32>
    %6 = vector.shape_cast %5 : vector<1x64x1xf32> to vector<64x1xf32>
    %7 = vector.broadcast %6 : vector<64x1xf32> to vector<64x512xf32>
    %8 = arith.addf %4, %7 : vector<64x512xf32>
    %cst_7 = arith.constant 0.000000e+00 : f32
    %9 = vector.broadcast %cst_7 : f32 to vector<64x512xf32>
    %10 = arith.maximumf %8, %9 : vector<64x512xf32>
    %c1 = arith.constant 1 : index
    %c0_8 = arith.constant 0 : index
    %c0_9 = arith.constant 0 : index
    %11 = vector.load %arg2[%c1, %c0_8, %c0_9] : memref<5x64x64xbf16, #tpu.memory_space<vmem>>, vector<1x64x64xbf16>
    %12 = vector.shape_cast %11 : vector<1x64x64xbf16> to vector<64x64xbf16>
    %13 = arith.truncf %10 : vector<64x512xf32> to vector<64x512xbf16>
    %cst_10 = arith.constant dense<0.000000e+00> : vector<64x512xf32>
    %14 = tpu.matmul %12, %13, %cst_10 {dimension_numbers = #tpu.dot_dimension_numbers<[1], [0], [0], [1], [0, 0, 1, 1], [], []>} : vector<64x64xbf16>, vector<64x512xbf16>, vector<64x512xf32> -> vector<64x512xf32>
    %c1_11 = arith.constant 1 : index
    %c0_12 = arith.constant 0 : index
    %c0_13 = arith.constant 0 : index
    %15 = vector.load %arg3[%c1_11, %c0_12, %c0_13] : memref<5x64x1xf32, #tpu.memory_space<vmem>>, vector<1x64x1xf32>
    %16 = vector.shape_cast %15 : vector<1x64x1xf32> to vector<64x1xf32>
    %17 = vector.broadcast %16 : vector<64x1xf32> to vector<64x512xf32>
    %18 = arith.addf %14, %17 : vector<64x512xf32>
    %cst_14 = arith.constant 0.000000e+00 : f32
    %19 = vector.broadcast %cst_14 : f32 to vector<64x512xf32>
    %20 = arith.maximumf %18, %19 : vector<64x512xf32>
    %c2 = arith.constant 2 : index
    %c0_15 = arith.constant 0 : index
    %c0_16 = arith.constant 0 : index
    %21 = vector.load %arg2[%c2, %c0_15, %c0_16] : memref<5x64x64xbf16, #tpu.memory_space<vmem>>, vector<1x64x64xbf16>
    %22 = vector.shape_cast %21 : vector<1x64x64xbf16> to vector<64x64xbf16>
    %23 = arith.truncf %20 : vector<64x512xf32> to vector<64x512xbf16>
    %cst_17 = arith.constant dense<0.000000e+00> : vector<64x512xf32>
    %24 = tpu.matmul %22, %23, %cst_17 {dimension_numbers = #tpu.dot_dimension_numbers<[1], [0], [0], [1], [0, 0, 1, 1], [], []>} : vector<64x64xbf16>, vector<64x512xbf16>, vector<64x512xf32> -> vector<64x512xf32>
    %c2_18 = arith.constant 2 : index
    %c0_19 = arith.constant 0 : index
    %c0_20 = arith.constant 0 : index
    %25 = vector.load %arg3[%c2_18, %c0_19, %c0_20] : memref<5x64x1xf32, #tpu.memory_space<vmem>>, vector<1x64x1xf32>
    %26 = vector.shape_cast %25 : vector<1x64x1xf32> to vector<64x1xf32>
    %27 = vector.broadcast %26 : vector<64x1xf32> to vector<64x512xf32>
    %28 = arith.addf %24, %27 : vector<64x512xf32>
    %cst_21 = arith.constant 0.000000e+00 : f32
    %29 = vector.broadcast %cst_21 : f32 to vector<64x512xf32>
    %30 = arith.maximumf %28, %29 : vector<64x512xf32>
    %c3 = arith.constant 3 : index
    %c0_22 = arith.constant 0 : index
    %c0_23 = arith.constant 0 : index
    %31 = vector.load %arg2[%c3, %c0_22, %c0_23] : memref<5x64x64xbf16, #tpu.memory_space<vmem>>, vector<1x64x64xbf16>
    %32 = vector.shape_cast %31 : vector<1x64x64xbf16> to vector<64x64xbf16>
    %33 = arith.truncf %30 : vector<64x512xf32> to vector<64x512xbf16>
    %cst_24 = arith.constant dense<0.000000e+00> : vector<64x512xf32>
    %34 = tpu.matmul %32, %33, %cst_24 {dimension_numbers = #tpu.dot_dimension_numbers<[1], [0], [0], [1], [0, 0, 1, 1], [], []>} : vector<64x64xbf16>, vector<64x512xbf16>, vector<64x512xf32> -> vector<64x512xf32>
    %c3_25 = arith.constant 3 : index
    %c0_26 = arith.constant 0 : index
    %c0_27 = arith.constant 0 : index
    %35 = vector.load %arg3[%c3_25, %c0_26, %c0_27] : memref<5x64x1xf32, #tpu.memory_space<vmem>>, vector<1x64x1xf32>
    %36 = vector.shape_cast %35 : vector<1x64x1xf32> to vector<64x1xf32>
    %37 = vector.broadcast %36 : vector<64x1xf32> to vector<64x512xf32>
    %38 = arith.addf %34, %37 : vector<64x512xf32>
    %cst_28 = arith.constant 0.000000e+00 : f32
    %39 = vector.broadcast %cst_28 : f32 to vector<64x512xf32>
    %40 = arith.maximumf %38, %39 : vector<64x512xf32>
    %c4 = arith.constant 4 : index
    %c0_29 = arith.constant 0 : index
    %c0_30 = arith.constant 0 : index
    %41 = vector.load %arg2[%c4, %c0_29, %c0_30] : memref<5x64x64xbf16, #tpu.memory_space<vmem>>, vector<1x64x64xbf16>
    %42 = vector.shape_cast %41 : vector<1x64x64xbf16> to vector<64x64xbf16>
    %43 = arith.truncf %40 : vector<64x512xf32> to vector<64x512xbf16>
    %cst_31 = arith.constant dense<0.000000e+00> : vector<64x512xf32>
    %44 = tpu.matmul %42, %43, %cst_31 {dimension_numbers = #tpu.dot_dimension_numbers<[1], [0], [0], [1], [0, 0, 1, 1], [], []>} : vector<64x64xbf16>, vector<64x512xbf16>, vector<64x512xf32> -> vector<64x512xf32>
    %c4_32 = arith.constant 4 : index
    %c0_33 = arith.constant 0 : index
    %c0_34 = arith.constant 0 : index
    %45 = vector.load %arg3[%c4_32, %c0_33, %c0_34] : memref<5x64x1xf32, #tpu.memory_space<vmem>>, vector<1x64x1xf32>
    %46 = vector.shape_cast %45 : vector<1x64x1xf32> to vector<64x1xf32>
    %47 = vector.broadcast %46 : vector<64x1xf32> to vector<64x512xf32>
    %48 = arith.addf %44, %47 : vector<64x512xf32>
    %49 = vector.extract_strided_slice %48 {offsets = [0, 0], sizes = [8, 512], strides = [1, 1]} : vector<64x512xf32> to vector<8x512xf32>
    %c0_35 = arith.constant 0 : index
    %c0_36 = arith.constant 0 : index
    %50 = vector.load %arg4[%c0_35, %c0_36] : memref<8x512xf32, #tpu.memory_space<vmem>>, vector<8x512xf32>
    tpu.vector_store %arg4[%c0_35, %c0_36], %49 {strides = array<i32>} : memref<8x512xf32, #tpu.memory_space<vmem>>, vector<8x512xf32>,
    return
  }
  func.func @transform_0(%arg0: i32) -> (i32, i32) {
    %c0_i32 = arith.constant 0 : i32
    %c0_i32_0 = arith.constant 0 : i32
    return %c0_i32, %arg0 : i32, i32
  }
  func.func @transform_1(%arg0: i32) -> (i32, i32, i32) {
    %c0_i32 = arith.constant 0 : i32
    %c0_i32_0 = arith.constant 0 : i32
    %c0_i32_1 = arith.constant 0 : i32
    %c0_i32_2 = arith.constant 0 : i32
    return %c0_i32, %c0_i32_0, %c0_i32_1 : i32, i32, i32
  }
  func.func @transform_2(%arg0: i32) -> (i32, i32, i32) {
    %c0_i32 = arith.constant 0 : i32
    %c0_i32_0 = arith.constant 0 : i32
    %c0_i32_1 = arith.constant 0 : i32
    %c0_i32_2 = arith.constant 0 : i32
    return %c0_i32, %c0_i32_0, %c0_i32_1 : i32, i32, i32
  }
  func.func @transform_3(%arg0: i32) -> (i32, i32) {
    %c0_i32 = arith.constant 0 : i32
    %c0_i32_0 = arith.constant 0 : i32
    return %c0_i32, %arg0 : i32, i32
  }
}

</mosaic_0001>

<bundles_post_ra>
// kernel: _forward_lane_dense_impl.1
= control target key start
LH: loop header
LB: loop body
LE: loop exit
PB: predicated region body
PF: predicated region fallthrough
CT: control target
= control target key end

     0   :  { %8 = vsyncpa [#allocation4], 0  ;;  %s2545_s0 = inlined_call_operand.vmem [shape: f32[16,1024], index: 0, kind: input, shape index: {}]   ;;  %s2546_s1 = inlined_call_operand.vmem [shape: bf16[5,64,64], index: 1, kind: input, shape index: {}]   ;;  %s2547_s2 = inlined_call_operand.vmem [shape: f32[5,64,1], index: 2, kind: input, shape index: {}]   ;;  %s2548_s3 = inlined_call_operand.hbm [shape: f32[8,1024], index: 3, kind: output, shape index: {}]  }
   0x1   :  { %10 = vsyncpa [#allocation4 + $0x1], 0  ;;  %s1925_s12 = smov 0   ;;  %s1927_s13 = smov 0  }
   0x2   :  { %s1929_s14 = smov 0   ;;  %s1931_s15 = smov 0  }
   0x3 LB: > { %s1638_s16 = sadd.s32 4294967295, %s1901_s15   ;;  %s1639_s17 = sadd.s32 4294967294, %s1901_s15   ;;  %s1901_s15 = sphi %s1931_s15, %s2554_s15   ;;  %s1897_s14 = sphi %s1929_s14, %s2553_s14   ;;  %s1893_s13 = sphi %s1927_s13, %s2552_s13   ;;  %s1889_s12 = sphi %s1925_s12, %s2551_s12  }
   0x4   : > { %s1948_s18 = sadd.s32 1, %s1901_s15   ;;  %s23_s19 = sadd.s32 1, %s1897_s14 }
   0x5   : > { %s20_s20 = ssub.s32 %s1901_s15, %s1948_s18  ;;  %p30_p0 = scmp.ne.s32.totalorder %s1897_s14, %s1893_s13 }
   0x6   : > { %p21_p1 = scmp.eq.s32.totalorder %s20_s20, 0  ;;  %p31_p2 = scmp.eq.s32.totalorder %s1901_s15, 0 }
   0x7   : > { %p102_p3 = scmp.eq.s32.totalorder %s1638_s16, 1  ;;  %p107_p4 = scmp.ne.s32.totalorder %s1893_s13, %s1889_s12 }
   0x8   : > { %s1961_s21 = scalar_select %p21_p1, %s1897_s14, %s23_s19  }
   0x9   : > { %p32_p5 = por %p31_p2, %p30_p0  ;;  %p1963_p6 = por %p102_p3, %p30_p0 }
   0xa   : > { %p108_p7 = scmp.eq.s32.totalorder %s1639_s17, 1  ;;  %p1641_p9 = scmp.ge.s32.totalorder %s1901_s15, 2 }
   0xc   : > { %p1967_p8 = por %p108_p7, %p107_p4  ;;  %130 = sbr.rel (%p1641_p9) target bundleno = 25 (0x19), region = 24 }
  0x11   : > { %133 = sbr.rel (!%p32_p5) target bundleno = 25 (0x19), region = 28  ;;  %s135_s24 = sand.u32 (%p32_p5), 1, %s1897_s14  }
  0x12   : > { %s1777_s25 = sshll.u32 (%p32_p5), %s1901_s15, 5  ;;  %s1642_s26 = sshll.u32 (%p32_p5), %s135_s24, 6 }
  0x13   : > { %s140_s29 = scalar_lea.vmem (%p32_p5), %s2545_s0, %s1777_s25  ;;  %s137_s30 = scalar_lea.vmem (%p32_p5), [#allocation2], %s1642_s26 }
  0x14   : > { %v153_v0 = vld [vmem:[%s140_s29] sm:$0xff] (%p32_p5)  ;;  %v155_v1 = vld [vmem:[%s140_s29 + $0x8] sm:$0xff] (%p32_p5)  ;;  %v157_v2 = vld [vmem:[%s140_s29 + $0x10] sm:$0xff] (%p32_p5) }
  0x15   : > { %154 = vst [vmem:[%s137_s30] sm:$0xff] (%p32_p5), %v153_v0  ;;  %156 = vst [vmem:[%s137_s30 + $0x8] sm:$0xff] (%p32_p5), %v155_v1  ;;  %v159_v3 = vld [vmem:[%s140_s29 + $0x18] sm:$0xff] (%p32_p5)  ;;  %v161_v4 = vld [vmem:[%s140_s29 + $0x40] sm:$0xff] (%p32_p5) }
  0x16   : > { %158 = vst [vmem:[%s137_s30 + $0x10] sm:$0xff] %v157_v2  ;;  %v163_v5 = vld [vmem:[%s140_s29 + $0x48] sm:$0xff]  ;;  %160 = vst [vmem:[%s137_s30 + $0x18] sm:$0xff] %v159_v3  ;;  %v165_v6 = vld [vmem:[%s140_s29 + $0x50] sm:$0xff] }
  0x17   : > { %162 = vst [vmem:[%s137_s30 + $0x20] sm:$0xff] %v161_v4  ;;  %164 = vst [vmem:[%s137_s30 + $0x28] sm:$0xff] %v163_v5  ;;  %v167_v7 = vld [vmem:[%s140_s29 + $0x58] sm:$0xff] }
  0x18   : > { %166 = vst [vmem:[%s137_s30 + $0x30] sm:$0xff] %v165_v6  ;;  %168 = vst [vmem:[%s137_s30 + $0x38] sm:$0xff] %v167_v7 }
  0x19 PF: > { %p1645_p10 = scmp.ge.s32.totalorder %s1901_s15, 1  ;;  %p173_p11 = scmp.lt.s32.totalorder %s1901_s15, 3 }
  0x1b   : > { %p174_p12 = pnand %p1645_p10, %p173_p11 }
  0x1c   : > { %s1982_s4 = sand.u32 (!%p174_p12), 1, %s1893_s13   ;;  %s1778_s17 = sshll.u32 (!%p174_p12), %s1638_s16, 9 }
  0x1d   : > { %177 = sbr.rel (%p174_p12) target bundleno = 1256 (0x4e8), region = 51  ;;  %s1646_s5 = sshll.u32 (!%p174_p12), %s1982_s4, 6 }
  0x1e   : > { %s182_s6 = scalar_lea.vmem (!%p174_p12), [#allocation2], %s1646_s5  ;;  %s1647_s11 = sshll.u32 (!%p174_p12), %s1982_s4, 5 }
  0x1f   : > { %s202_s19 = scalar_lea.vmem (!%p174_p12), [#allocation3], %s1647_s11  ;;  %s2502_s26 = scalar_lea.hbm (!%p174_p12), %s2548_s3, %s1778_s17 }
  0x20   : > { %s1574_s20 = sshll.u32 (!%p174_p12), %s202_s19, 4  ;;  %s1560_s16 = scalar_lea.sflag (!%p174_p12), [#allocation4], %s1982_s4  ;;  %s2504_s20 = int_to_ptr.vmem [resolvable:$true] %s1574_s20 }
  0x21   : > { %s1841_s27 = scalar_lea.vmem (!%p174_p12), %s2504_s20, 512  ;;  %s1904_s28 = smov (!%p174_p12), [#allocation3]  }
  0x22   : > { %v1903_v8 = vmov 0   ;;  %v207_v9 = vld [vmem:[%s182_s6 + $0x8] sm:$0xff]  ;;  %v209_v11 = vld [vmem:[%s182_s6 + $0x18] sm:$0xff]  ;;  %v206_v14 = vld [vmem:[%s182_s6] sm:$0xff]  ;;  %vm294_vm0 = vcmask 130048   ;;  %vm579_vm1 = vcmask 523264   ;;  %p1842_p13 = scmp.ne.s32.totalorder %s2504_s20, %s1841_s27 }
  0x23   : > { %339 = vmatprep.mubr.bf16.mxu0 %v1903_v8  ;;  %412 = vmatprep.mubr.bf16.mxu1 %v1903_v8  ;;  %v211_v10 = vld [vmem:[%s182_s6 + $0x28] sm:$0xff]  ;;  %v213_v13 = vld [vmem:[%s182_s6 + $0x38] sm:$0xff]  ;;  %v210_v15 = vld [vmem:[%s182_s6 + $0x20] sm:$0xff]  ;;  %s1845_s29 = sshll.u32 %s1904_s28, 4  ;;  %s1846_s29 = int_to_ptr.vmem [resolvable:$false] %s1845_s29 }
  0x24   : > { %1819 = vset.pattern.permute.xlu0 %v1903_v8  ;;  %1820 = vset.pattern.permute.xlu1 %v1903_v8  ;;  %v215_v12 = vpack.c.bf16 %v211_v10, %v207_v9  ;;  %v217_v16 = vpack.c.bf16 %v213_v13, %v209_v11  ;;  %v214_v17 = vpack.c.bf16 %v210_v15, %v206_v14  ;;  %v208_v18 = vld [vmem:[%s182_s6 + $0x10] sm:$0xff]  ;;  %v1821_v21 = vld [vmem:[%s2546_s1] sm:$0xff]   ;;  %v233_v24 = vld [vmem:[%s2547_s2 + $0x38] sm:$0xff]  ;;  %p1843_p0 = pnand %p1842_p13, %p1963_p6  ;;  %s1847_s30 = scalar_lea.vmem %s1846_s29, 1024 }
  0x25   : > { %v212_v19 = vld [vmem:[%s182_s6 + $0x30] sm:$0xff]  ;;  %v230_v23 = vld [vmem:[%s2547_s2 + $0x20] sm:$0xff]  ;;  %v231_v25 = vld [vmem:[%s2547_s2 + $0x28] sm:$0xff]  ;;  %p1848_p2 = scmp.lt.s32.totalorder %s2504_s20, %s1846_s29  ;;  %p1849_p3 = scmp.lt.s32.totalorder %s1847_s30, %s1841_s27 }
  0x26   : > { %321 = vmatprep.subr.bf16.mxu0 %v215_v12  ;;  %v216_v20 = vpack.c.bf16 %v212_v19, %v208_v18  ;;  %394 = vmatprep.subr.bf16.mxu1 %v217_v16  ;;  %v232_v22 = vld [vmem:[%s2547_s2 + $0x30] sm:$0xff]  ;;  %v1822_v27 = vld [vmem:[%s2546_s1 + $0x8] sm:$0xff]   ;;  %v229_v28 = vld [vmem:[%s2547_s2 + $0x18] sm:$0xff]  ;;  %p1844_p1 = pneg %p1843_p0 }
  0x27   : > { %322 = vmatpush1.bf16.msra.mxu0 %v214_v17  ;;  %266 = vperm.xlu0 %1819, %v232_v22   ;;  %v228_v26 = vld [vmem:[%s2547_s2 + $0x10] sm:$0xff]  ;;  %v226_v29 = vld [vmem:[%s2547_s2] sm:$0xff]  ;;  %v227_v30 = vld [vmem:[%s2547_s2 + $0x8] sm:$0xff]  ;;  %p1850_p4 = por %p1849_p3, %p1848_p2 }
  0x28   : > { %395 = vmatpush1.bf16.msra.mxu1 %v216_v20  ;;  %256 = vperm.xlu1 %1820, %v230_v23   ;;  %v1674_v31 = vld [vmem:[%s2547_s2 + $0x70] sm:$0xff]  ;;  %v1675_v33 = vld [vmem:[%s2547_s2 + $0x78] sm:$0xff]  ;;  %v1672_v34 = vld [vmem:[%s2547_s2 + $0x60] sm:$0xff] }
  0x29   : > { %v1823_v32 = vld [vmem:[%s2546_s1 + $0x10] sm:$0xff]   ;;  %v1673_v35 = vld [vmem:[%s2547_s2 + $0x68] sm:$0xff]  ;;  %v1824_v37 = vld [vmem:[%s2546_s1 + $0x18] sm:$0xff]   ;;  %p1851_p5 = pnand %p1850_p4, %p1844_p1 }
  0x2a   : > { %1652 = vmatmul.mubr.msk.bf16.vlgmr.msra.gmra.mxu0 %vm294_vm0, %v1821_v21  ;;  %v1670_v36 = vld [vmem:[%s2547_s2 + $0x50] sm:$0xff]  ;;  %v1671_v38 = vld [vmem:[%s2547_s2 + $0x58] sm:$0xff]  ;;  %v1668_v39 = vld [vmem:[%s2547_s2 + $0x40] sm:$0xff] }
  0x2b   : > { %1656 = vmatmul.mubr.msk.bf16.vlgmr.msra.gmra.mxu1 %vm294_vm0, %v1821_v21  ;;  %349 = vmatprep.mubr.bf16.mxu0 %v1903_v8  ;;  %v1669_v40 = vld [vmem:[%s2547_s2 + $0x48] sm:$0xff]  ;;  %v1702_v41 = vld [vmem:[%s2547_s2 + $0xb0] sm:$0xff]  ;;  %v1703_v42 = vld [vmem:[%s2547_s2 + $0xb8] sm:$0xff] }
  0x2c   : > { %422 = vmatprep.mubr.bf16.mxu1 %v1903_v8  ;;  %271 = vperm.xlu0 %1819, %v233_v24   ;;  %v1700_v43 = vld [vmem:[%s2547_s2 + $0xa0] sm:$0xff]  ;;  %v1701_v44 = vld [vmem:[%s2547_s2 + $0xa8] sm:$0xff]  ;;  %v1698_v45 = vld [vmem:[%s2547_s2 + $0x90] sm:$0xff] }
  0x2d   : > { %261 = vperm.xlu1 %1820, %v231_v25   ;;  %v1699_v46 = vld [vmem:[%s2547_s2 + $0x98] sm:$0xff]  ;;  %v1696_v47 = vld [vmem:[%s2547_s2 + $0x80] sm:$0xff]  ;;  %v1697_v48 = vld [vmem:[%s2547_s2 + $0x88] sm:$0xff] }
  0x2e   : > { %v1730_v49 = vld [vmem:[%s2547_s2 + $0xf0] sm:$0xff]  ;;  %v1731_v50 = vld [vmem:[%s2547_s2 + $0xf8] sm:$0xff]  ;;  %v1728_v51 = vld [vmem:[%s2547_s2 + $0xe0] sm:$0xff] }
  0x2f   : > { %v1729_v52 = vld [vmem:[%s2547_s2 + $0xe8] sm:$0xff]  ;;  %v1726_v53 = vld [vmem:[%s2547_s2 + $0xd0] sm:$0xff]  ;;  %v1727_v54 = vld [vmem:[%s2547_s2 + $0xd8] sm:$0xff] }
  0x30   : > { %246 = vperm.xlu0 %1819, %v228_v26   ;;  %v1724_v55 = vld [vmem:[%s2547_s2 + $0xc0] sm:$0xff]  ;;  %v1725_v56 = vld [vmem:[%s2547_s2 + $0xc8] sm:$0xff] }
  0x31   : > { %251 = vperm.xlu1 %1820, %v229_v28   ;;  %v1752_v57 = vld [vmem:[%s2547_s2 + $0x100] sm:$0xff] }
  0x32   : > { %1653 = vmatmul.mubr.msk.bf16.gmra.mxu0 %vm294_vm0, %v1822_v27 }
  0x33   : > { %1657 = vmatmul.mubr.msk.bf16.gmra.mxu1 %vm294_vm0, %v1822_v27  ;;  %359 = vmatprep.mubr.bf16.mxu0 %v1903_v8 }
  0x34   : > { %432 = vmatprep.mubr.bf16.mxu1 %v1903_v8  ;;  %236 = vperm.xlu0 %1819, %v226_v29  }
  0x35   : > { %241 = vperm.xlu1 %1820, %v227_v30  }
  0x38   : > { %551 = vperm.xlu0 %1819, %v1674_v31  }
  0x39   : > { %556 = vperm.xlu1 %1820, %v1675_v33  }
  0x3a   : > { %1654 = vmatmul.mubr.msk.bf16.gmra.mxu0 %vm294_vm0, %v1823_v32 }
  0x3b   : > { %1658 = vmatmul.mubr.msk.bf16.gmra.mxu1 %vm294_vm0, %v1823_v32  ;;  %369 = vmatprep.mubr.bf16.mxu0 %v1903_v8 }
  0x3c   : > { %442 = vmatprep.mubr.bf16.mxu1 %v1903_v8  ;;  %541 = vperm.xlu0 %1819, %v1672_v34  }
  0x3d   : > { %546 = vperm.xlu1 %1820, %v1673_v35  }
  0x40   : > { %531 = vperm.xlu0 %1819, %v1670_v36  }
  0x41   : > { %536 = vperm.xlu1 %1820, %v1671_v38  }
  0x42   : > { %1655 = vmatmul.mubr.msk.bf16.gmra.mxu0 %vm294_vm0, %v1824_v37 }
  0x43   : > { %1659 = vmatmul.mubr.msk.bf16.gmra.mxu1 %vm294_vm0, %v1824_v37  ;;  %624 = vmatprep.mubr.bf16.mxu0 %v1903_v8 }
  0x44   : > { %521 = vperm.xlu0 %1819, %v1668_v39   ;;  %697 = vmatprep.mubr.bf16.mxu1 %v1903_v8 }
  0x45   : > { %526 = vperm.xlu1 %1820, %v1669_v40  }
  0x48   : > { %836 = vperm.xlu0 %1819, %v1702_v41  }
  0x49   : > { %841 = vperm.xlu1 %1820, %v1703_v42  }
  0x4c   : > { %826 = vperm.xlu0 %1819, %v1700_v43  }
  0x4d   : > { %831 = vperm.xlu1 %1820, %v1701_v44  }
  0x50   : > { %816 = vperm.xlu0 %1819, %v1698_v45  }
  0x51   : > { %821 = vperm.xlu1 %1820, %v1699_v46  }
  0x54   : > { %806 = vperm.xlu0 %1819, %v1696_v47  }
  0x55   : > { %811 = vperm.xlu1 %1820, %v1697_v48  }
  0x58   : > { %1120 = vperm.xlu0 %1819, %v1730_v49  }
  0x59   : > { %1125 = vperm.xlu1 %1820, %v1731_v50  }
  0x5c   : > { %1110 = vperm.xlu0 %1819, %v1728_v51  }
  0x5d   : > { %1115 = vperm.xlu1 %1820, %v1729_v52  }
  0x60   : > { %1100 = vperm.xlu0 %1819, %v1726_v53  }
  0x61   : > { %1105 = vperm.xlu1 %1820, %v1727_v54  }
  0x64   : > { %1090 = vperm.xlu0 %1819, %v1724_v55  }
  0x65   : > { %1095 = vperm.xlu1 %1820, %v1725_v56  }
  0x68   : > { %1374 = vperm.xlu0 %1819, %v1752_v57  }
  0xa2   : > { %v267_v1 = vpop.permute.xlu0 %266 }
  0xa3   : > { %v2124_v3 = vpop.permute.xlu1 %256 }
  0xa7   : > { %v272_v10 = vpop.permute.xlu0 %271 }
  0xa8   : > { %v262_v12 = vpop.permute.xlu1 %261 }
  0xab   : > { %v2130_v18 = vpop.permute.xlu0 %246 }
  0xac   : > { %v252_v20 = vpop.permute.xlu1 %251 }
  0xaf   : > { %v2132_v26 = vpop.permute.xlu0 %236 }
  0xb0   : > { %v2134_v28 = vpop.permute.xlu1 %241 }
  0xea   : > { %v2116_v58 = vpop.f32.mrf.mxu0 }
  0xeb   : > { %v2118_v59 = vpop.f32.mrf.mxu1 }
  0xec   : > { %v343_v60 = vpop.f32.mrf.mxu0 }
  0xed   : > { %v416_v61 = vpop.f32.mrf.mxu1  ;;  %v2137_v29 = vadd.f32 %v343_v60, %v2132_v26 }
  0xee   : > { %v2120_v62 = vpop.f32.mrf.mxu0  ;;  %v2140_v30 = vadd.f32 %v416_v61, %v2132_v26 }
  0xef   : > { %v2122_v63 = vpop.f32.mrf.mxu1 }
  0xf0   : > { %v347_v0 = vpop.f32.mrf.mxu0 }
  0xf1   : > { %v420_v2 = vpop.f32.mrf.mxu1  ;;  %v2143_v32 = vadd.f32 %v347_v0, %v2134_v28 }
  0xf2   : > { %v2126_v4 = vpop.f32.mrf.mxu0  ;;  %v2146_v33 = vadd.f32 %v420_v2, %v2134_v28 }
  0xf3   : > { %v2128_v5 = vpop.f32.mrf.mxu1 }
  0xf4   : > { %v353_v6 = vpop.f32.mrf.mxu0 }
  0xf5   : > { %v426_v7 = vpop.f32.mrf.mxu1  ;;  %v2149_v34 = vadd.f32 %v353_v6, %v2130_v18 }
  0xf6   : > { %v355_v9 = vpop.f32.mrf.mxu0  ;;  %v2152_v35 = vadd.f32 %v426_v7, %v2130_v18 }
  0xf7   : > { %v428_v11 = vpop.f32.mrf.mxu1  ;;  %v2154_v37 = vadd.f32 %v355_v9, %v252_v20 }
  0xf8   : > { %v357_v13 = vpop.f32.mrf.mxu0  ;;  %v2156_v38 = vadd.f32 %v428_v11, %v252_v20 }
  0xf9   : > { %v430_v14 = vpop.f32.mrf.mxu1  ;;  %v2158_v39 = vadd.f32 %v357_v13, %v252_v20 }
  0xfa   : > { %v361_v15 = vpop.f32.mrf.mxu0  ;;  %v2160_v40 = vadd.f32 %v430_v14, %v252_v20 }
  0xfb   : > { %v434_v16 = vpop.f32.mrf.mxu1  ;;  %v362_v42 = vadd.f32 %v361_v15, %v2124_v3 }
  0xfc   : > { %v363_v17 = vpop.f32.mrf.mxu0  ;;  %v435_v20 = vadd.f32 %v434_v16, %v2124_v3  ;;  %v346_v16 = vadd.f32 %v2120_v62, %v2134_v28  ;;  %v467_v62 = vmax.f32 %v2156_v38, 0.0 }
  0xfd   : > { %v436_v19 = vpop.f32.mrf.mxu1  ;;  %v364_v52 = vadd.f32 %v363_v17, %v2124_v3 }
  0xfe   : > { %v365_v21 = vpop.f32.mrf.mxu0  ;;  %v437_v53 = vadd.f32 %v436_v19, %v2124_v3 }
  0xff   : > { %v438_v22 = vpop.f32.mrf.mxu1  ;;  %v366_v57 = vadd.f32 %v365_v21, %v262_v12  ;;  %v470_v17 = vmax.f32 %v364_v52, 0.0 }
 0x100   : > { %v367_v23 = vpop.f32.mrf.mxu0  ;;  %v439_v60 = vadd.f32 %v438_v22, %v262_v12 }
 0x101   : > { %v440_v24 = vpop.f32.mrf.mxu1  ;;  %v368_v43 = vadd.f32 %v367_v23, %v262_v12 }
 0x102   : > { %v371_v25 = vpop.f32.mrf.mxu0  ;;  %v441_v47 = vadd.f32 %v440_v24, %v262_v12  ;;  %v473_v24 = vmax.f32 %v366_v57, 0.0  ;;  %v466_v12 = vmax.f32 %v2158_v39, 0.0  ;;  %v462_v39 = vmax.f32 %v2149_v34, 0.0 }
 0x103   : > { %v444_v27 = vpop.f32.mrf.mxu1  ;;  %v372_v48 = vadd.f32 %v371_v25, %v267_v1  ;;  %v474_v2 = vmax.f32 %v368_v43, 0.0  ;;  %v425_v43 = vadd.f32 %v2128_v5, %v2130_v18  ;;  %v460_v34 = vmax.f32 %v2146_v33, 0.0 }
 0x104   : > { %v373_v31 = vpop.f32.mrf.mxu0  ;;  %v445_v54 = vadd.f32 %v444_v27, %v267_v1  ;;  %v476_v11 = vmax.f32 %v441_v47, 0.0  ;;  %v499_v47 = vpack.c.bf16 %v466_v12, %v462_v39 }
 0x105   : > { %v446_v36 = vpop.f32.mrf.mxu1  ;;  %v374_v44 = vadd.f32 %v373_v31, %v267_v1  ;;  %v477_v13 = vmax.f32 %v372_v48, 0.0  ;;  %v503_v22 = vpack.c.bf16 %v474_v2, %v470_v17  ;;  %v352_v31 = vadd.f32 %v2126_v4, %v2130_v18 }
 0x106   : > { %v375_v41 = vpop.f32.mrf.mxu0  ;;  %v447_v49 = vadd.f32 %v446_v36, %v267_v1  ;;  %v479_v23 = vmax.f32 %v445_v54, 0.0  ;;  %v472_v1 = vmax.f32 %v437_v53, 0.0  ;;  %v468_v36 = vmax.f32 %v2160_v40, 0.0  ;;  %v1827_v54 = vld [vmem:[%s2546_s1 + $0x30] sm:$0xff]  }
 0x107   : > { %v376_v45 = vadd.f32 %v375_v41, %v272_v10  ;;  %v448_v46 = vpop.f32.mrf.mxu1  ;;  %v478_v6 = vmax.f32 %v374_v44, 0.0  ;;  %v469_v41 = vmax.f32 %v362_v42, 0.0  ;;  %v471_v44 = vmax.f32 %v435_v20, 0.0 }
 0x108   : > { %v449_v50 = vadd.f32 %v448_v46, %v272_v10  ;;  %v377_v51 = vpop.f32.mrf.mxu0  ;;  %v480_v14 = vmax.f32 %v447_v49, 0.0  ;;  %v505_v3 = vpack.c.bf16 %v476_v11, %v472_v1  ;;  %v419_v4 = vadd.f32 %v2122_v63, %v2134_v28  ;;  %v557_v11 = vpop.permute.xlu1 %556 }
 0x109   : > { %v378_v55 = vadd.f32 %v377_v51, %v272_v10  ;;  %v450_v56 = vpop.f32.mrf.mxu1  ;;  %v481_v61 = vmax.f32 %v376_v45, 0.0  ;;  %v464_v40 = vmax.f32 %v2152_v35, 0.0  ;;  %v465_v42 = vmax.f32 %v2154_v37, 0.0 }
 0x10a   : > { %v451_v0 = vadd.f32 %v450_v56, %v272_v10  ;;  %v483_v7 = vmax.f32 %v449_v50, 0.0  ;;  %v475_v10 = vmax.f32 %v439_v60, 0.0  ;;  %v502_v45 = vpack.c.bf16 %v473_v24, %v469_v41 }
 0x10b   : > { %v482_v9 = vmax.f32 %v378_v55, 0.0  ;;  %v506_v25 = vpack.c.bf16 %v481_v61, %v477_v13  ;;  %v458_v46 = vmax.f32 %v2143_v32, 0.0  ;;  %v342_v18 = vadd.f32 %v2116_v58, %v2132_v26  ;;  %v1828_v55 = vld [vmem:[%s2546_s1 + $0x38] sm:$0xff]  }
 0x10c   : > { %v484_v15 = vmax.f32 %v451_v0, 0.0  ;;  %v508_v27 = vpack.c.bf16 %v483_v7, %v479_v23  ;;  %v504_v5 = vpack.c.bf16 %v475_v10, %v471_v44  ;;  %v461_v48 = vmax.f32 %v352_v31, 0.0  ;;  %v552_v7 = vpop.permute.xlu0 %551  ;;  %v547_v1 = vpop.permute.xlu1 %546 }
 0x10d   : > { %v507_v19 = vpack.c.bf16 %v482_v9, %v478_v6  ;;  %v501_v49 = vpack.c.bf16 %v468_v36, %v464_v40  ;;  %v415_v63 = vadd.f32 %v2118_v59, %v2132_v26  ;;  %v454_v28 = vmax.f32 %v2137_v29, 0.0  ;;  %v1825_v29 = vld [vmem:[%s2546_s1 + $0x20] sm:$0xff]  }
 0x10e   : > { %v509_v21 = vpack.c.bf16 %v484_v15, %v480_v14  ;;  %v463_v35 = vmax.f32 %v425_v43, 0.0  ;;  %v456_v32 = vmax.f32 %v2140_v30, 0.0  ;;  %v457_v37 = vmax.f32 %v346_v16, 0.0  ;;  %v1826_v30 = vld [vmem:[%s2546_s1 + $0x28] sm:$0xff]  }
 0x10f   : > { %600 = vmatprep.subr.bf16.mxu0 %v507_v19  ;;  %v498_v38 = vpack.c.bf16 %v465_v42, %v461_v48  ;;  %v459_v50 = vmax.f32 %v419_v4, 0.0  ;;  %v495_v58 = vpack.c.bf16 %v458_v46, %v454_v28  ;;  %v453_v33 = vmax.f32 %v342_v18, 0.0 }
 0x110   : > { %673 = vmatprep.subr.bf16.mxu1 %v509_v21  ;;  %601 = vmatpush1.bf16.msra.mxu0 %v506_v25  ;;  %v500_v51 = vpack.c.bf16 %v467_v62, %v463_v35  ;;  %v497_v52 = vpack.c.bf16 %v460_v34, %v456_v32  ;;  %v455_v53 = vmax.f32 %v415_v63, 0.0  ;;  %v542_v23 = vpop.permute.xlu0 %541  ;;  %v537_v31 = vpop.permute.xlu1 %536 }
 0x111   : > { %674 = vmatpush1.bf16.msra.mxu1 %v508_v27  ;;  %602 = vmatprep.subr.bf16.mxu0 %v503_v22  ;;  %v494_v59 = vpack.c.bf16 %v457_v37, %v453_v33 }
 0x112   : > { %675 = vmatprep.subr.bf16.mxu1 %v505_v3  ;;  %v496_v26 = vpack.c.bf16 %v459_v50, %v455_v53 }
 0x114   : > { %603 = vmatpush1.bf16.msra.mxu0 %v502_v45  ;;  %v2228_v22 = vpop.permute.xlu0 %531  ;;  %v2232_v4 = vpop.permute.xlu1 %526 }
 0x115   : > { %676 = vmatpush1.bf16.msra.mxu1 %v504_v5  ;;  %604 = vmatprep.subr.bf16.mxu0 %v499_v47 }
 0x116   : > { %677 = vmatprep.subr.bf16.mxu1 %v501_v49 }
 0x118   : > { %605 = vmatpush1.bf16.msra.mxu0 %v498_v38  ;;  %v2230_v39 = vpop.permute.xlu0 %521 }
 0x119   : > { %678 = vmatpush1.bf16.msra.mxu1 %v500_v51  ;;  %606 = vmatprep.subr.bf16.mxu0 %v495_v58 }
 0x11a   : > { %679 = vmatprep.subr.bf16.mxu1 %v497_v52 }
 0x11c   : > { %607 = vmatpush1.bf16.msra.mxu0 %v494_v59 }
 0x11d   : > { %680 = vmatpush1.bf16.msra.mxu1 %v496_v26 }
 0x11f   : > { %1680 = vmatmul.mubr.msk.bf16.vlgmr.msra.gmra.mxu0 %vm579_vm1, %v1825_v29 }
 0x120   : > { %1684 = vmatmul.mubr.msk.bf16.vlgmr.msra.gmra.mxu1 %vm579_vm1, %v1825_v29  ;;  %634 = vmatprep.mubr.bf16.mxu0 %v1903_v8 }
 0x121   : > { %707 = vmatprep.mubr.bf16.mxu1 %v1903_v8 }
 0x127   : > { %1681 = vmatmul.mubr.msk.bf16.gmra.mxu0 %vm579_vm1, %v1826_v30 }
 0x128   : > { %1685 = vmatmul.mubr.msk.bf16.gmra.mxu1 %vm579_vm1, %v1826_v30  ;;  %644 = vmatprep.mubr.bf16.mxu0 %v1903_v8 }
 0x129   : > { %717 = vmatprep.mubr.bf16.mxu1 %v1903_v8 }
 0x12f   : > { %1682 = vmatmul.mubr.msk.bf16.gmra.mxu0 %vm579_vm1, %v1827_v54 }
 0x130   : > { %1686 = vmatmul.mubr.msk.bf16.gmra.mxu1 %vm579_vm1, %v1827_v54  ;;  %654 = vmatprep.mubr.bf16.mxu0 %v1903_v8 }
 0x131   : > { %727 = vmatprep.mubr.bf16.mxu1 %v1903_v8 }
 0x137   : > { %1683 = vmatmul.mubr.msk.bf16.gmra.mxu0 %vm579_vm1, %v1828_v55 }
 0x138   : > { %1687 = vmatmul.mubr.msk.bf16.gmra.mxu1 %vm579_vm1, %v1828_v55  ;;  %908 = vmatprep.mubr.bf16.mxu0 %v1903_v8 }
 0x139   : > { %981 = vmatprep.mubr.bf16.mxu1 %v1903_v8 }
 0x1df   : > { %v2216_v56 = vpop.f32.mrf.mxu0 }
 0x1e0   : > { %v2218_v57 = vpop.f32.mrf.mxu1 }
 0x1e1   : > { %v628_v60 = vpop.f32.mrf.mxu0 }
 0x1e2   : > { %v701_v61 = vpop.f32.mrf.mxu1  ;;  %v2235_v40 = vadd.f32 %v628_v60, %v2230_v39 }
 0x1e3   : > { %v2220_v0 = vpop.f32.mrf.mxu0  ;;  %v2238_v42 = vadd.f32 %v701_v61, %v2230_v39 }
 0x1e4   : > { %v2222_v2 = vpop.f32.mrf.mxu1 }
 0x1e5   : > { %v632_v6 = vpop.f32.mrf.mxu0 }
 0x1e6   : > { %v705_v9 = vpop.f32.mrf.mxu1  ;;  %v2241_v46 = vadd.f32 %v632_v6, %v2232_v4 }
 0x1e7   : > { %v2224_v13 = vpop.f32.mrf.mxu0  ;;  %v2244_v62 = vadd.f32 %v705_v9, %v2232_v4 }
 0x1e8   : > { %v2226_v14 = vpop.f32.mrf.mxu1 }
 0x1e9   : > { %v638_v15 = vpop.f32.mrf.mxu0 }
 0x1ea   : > { %v711_v20 = vpop.f32.mrf.mxu1  ;;  %v2247_v47 = vadd.f32 %v638_v15, %v2228_v22 }
 0x1eb   : > { %v640_v17 = vpop.f32.mrf.mxu0  ;;  %v2250_v5 = vadd.f32 %v711_v20, %v2228_v22 }
 0x1ec   : > { %v713_v19 = vpop.f32.mrf.mxu1  ;;  %v2252_v34 = vadd.f32 %v640_v17, %v537_v31 }
 0x1ed   : > { %v642_v24 = vpop.f32.mrf.mxu0  ;;  %v2254_v48 = vadd.f32 %v713_v19, %v537_v31 }
 0x1ee   : > { %v715_v25 = vpop.f32.mrf.mxu1  ;;  %v2256_v49 = vadd.f32 %v642_v24, %v537_v31 }
 0x1ef   : > { %v646_v21 = vpop.f32.mrf.mxu0  ;;  %v2258_v63 = vadd.f32 %v715_v25, %v537_v31 }
 0x1f0   : > { %v719_v12 = vpop.f32.mrf.mxu1  ;;  %v647_v35 = vadd.f32 %v646_v21, %v542_v23 }
 0x1f1   : > { %v648_v10 = vpop.f32.mrf.mxu0  ;;  %v720_v31 = vadd.f32 %v719_v12, %v542_v23  ;;  %v631_v12 = vadd.f32 %v2220_v0, %v2232_v4  ;;  %v752_v0 = vmax.f32 %v2254_v48, 0.0 }
 0x1f2   : > { %v721_v27 = vpop.f32.mrf.mxu1  ;;  %v649_v59 = vadd.f32 %v648_v10, %v542_v23 }
 0x1f3   : > { %v650_v36 = vpop.f32.mrf.mxu0  ;;  %v722_v26 = vadd.f32 %v721_v27, %v542_v23 }
 0x1f4   : > { %v723_v41 = vpop.f32.mrf.mxu1  ;;  %v651_v55 = vadd.f32 %v650_v36, %v547_v1 }
 0x1f5   : > { %v652_v3 = vpop.f32.mrf.mxu0  ;;  %v724_v60 = vadd.f32 %v723_v41, %v547_v1  ;;  %v757_v27 = vmax.f32 %v722_v26, 0.0 }
 0x1f6   : > { %v725_v16 = vpop.f32.mrf.mxu1  ;;  %v653_v32 = vadd.f32 %v652_v3, %v547_v1  ;;  %v755_v3 = vmax.f32 %v649_v59, 0.0 }
 0x1f7   : > { %v656_v43 = vpop.f32.mrf.mxu0  ;;  %v726_v58 = vadd.f32 %v725_v16, %v547_v1  ;;  %v751_v1 = vmax.f32 %v2256_v49, 0.0  ;;  %v760_v36 = vmax.f32 %v724_v60, 0.0  ;;  %v747_v49 = vmax.f32 %v2247_v47, 0.0 }
 0x1f8   : > { %v729_v44 = vpop.f32.mrf.mxu1  ;;  %v657_v51 = vadd.f32 %v656_v43, %v552_v7  ;;  %v759_v9 = vmax.f32 %v653_v32, 0.0  ;;  %v710_v32 = vadd.f32 %v2226_v14, %v2228_v22  ;;  %v745_v47 = vmax.f32 %v2244_v62, 0.0 }
 0x1f9   : > { %v658_v45 = vpop.f32.mrf.mxu0  ;;  %v730_v29 = vadd.f32 %v729_v44, %v552_v7  ;;  %v761_v19 = vmax.f32 %v726_v58, 0.0  ;;  %v784_v58 = vpack.c.bf16 %v751_v1, %v747_v49 }
 0x1fa   : > { %v731_v18 = vpop.f32.mrf.mxu1  ;;  %v659_v37 = vadd.f32 %v658_v45, %v552_v7  ;;  %v762_v24 = vmax.f32 %v657_v51, 0.0  ;;  %v637_v45 = vadd.f32 %v2224_v13, %v2228_v22  ;;  %v704_v13 = vadd.f32 %v2222_v2, %v2232_v4 }
 0x1fb   : > { %v660_v28 = vpop.f32.mrf.mxu0  ;;  %v732_v33 = vadd.f32 %v731_v18, %v552_v7  ;;  %v764_v16 = vmax.f32 %v730_v29, 0.0  ;;  %v758_v7 = vmax.f32 %v651_v55, 0.0  ;;  %v753_v18 = vmax.f32 %v2258_v63, 0.0  ;;  %v1831_v29 = vld [vmem:[%s2546_s1 + $0x50] sm:$0xff]  }
 0x1fc   : > { %v661_v38 = vadd.f32 %v660_v28, %v557_v11  ;;  %v733_v50 = vpop.f32.mrf.mxu1  ;;  %v763_v15 = vmax.f32 %v659_v37, 0.0  ;;  %v754_v28 = vmax.f32 %v647_v35, 0.0  ;;  %v790_v23 = vpack.c.bf16 %v761_v19, %v757_v27  ;;  %v842_v19 = vpop.permute.xlu1 %841 }
 0x1fd   : > { %v734_v52 = vadd.f32 %v733_v50, %v557_v11  ;;  %v662_v53 = vpop.f32.mrf.mxu0  ;;  %v765_v25 = vmax.f32 %v732_v33, 0.0  ;;  %v756_v37 = vmax.f32 %v720_v31, 0.0  ;;  %v749_v63 = vmax.f32 %v2250_v5, 0.0 }
 0x1fe   : > { %v663_v30 = vadd.f32 %v662_v53, %v557_v11  ;;  %v735_v54 = vpop.f32.mrf.mxu1  ;;  %v766_v61 = vmax.f32 %v661_v38, 0.0  ;;  %v750_v35 = vmax.f32 %v2252_v34, 0.0  ;;  %v787_v38 = vpack.c.bf16 %v758_v7, %v754_v28 }
 0x1ff   : > { %v736_v6 = vadd.f32 %v735_v54, %v557_v11  ;;  %v768_v20 = vmax.f32 %v734_v52, 0.0  ;;  %v788_v11 = vpack.c.bf16 %v759_v9, %v755_v3  ;;  %v743_v50 = vmax.f32 %v2241_v46, 0.0 }
 0x200   : > { %v767_v17 = vmax.f32 %v663_v30, 0.0  ;;  %v791_v43 = vpack.c.bf16 %v766_v61, %v762_v24  ;;  %v789_v14 = vpack.c.bf16 %v760_v36, %v756_v37  ;;  %v627_v22 = vadd.f32 %v2216_v56, %v2230_v39  ;;  %v1832_v30 = vld [vmem:[%s2546_s1 + $0x58] sm:$0xff]   ;;  %v832_v27 = vpop.permute.xlu1 %831 }
 0x201   : > { %v769_v21 = vmax.f32 %v736_v6, 0.0  ;;  %v793_v41 = vpack.c.bf16 %v768_v20, %v764_v16  ;;  %v746_v51 = vmax.f32 %v637_v45, 0.0  ;;  %v786_v33 = vpack.c.bf16 %v753_v18, %v749_v63  ;;  %v837_v20 = vpop.permute.xlu0 %836 }
 0x202   : > { %v792_v10 = vpack.c.bf16 %v767_v17, %v763_v15  ;;  %v700_v2 = vadd.f32 %v2218_v57, %v2230_v39  ;;  %v739_v4 = vmax.f32 %v2235_v40, 0.0  ;;  %v748_v5 = vmax.f32 %v710_v32, 0.0  ;;  %v1829_v40 = vld [vmem:[%s2546_s1 + $0x40] sm:$0xff]  }
 0x203   : > { %v794_v44 = vpack.c.bf16 %v769_v21, %v765_v25  ;;  %v741_v46 = vmax.f32 %v2238_v42, 0.0  ;;  %v742_v34 = vmax.f32 %v631_v12, 0.0  ;;  %v783_v48 = vpack.c.bf16 %v750_v35, %v746_v51  ;;  %v1830_v42 = vld [vmem:[%s2546_s1 + $0x48] sm:$0xff]  }
 0x204   : > { %884 = vmatprep.subr.bf16.mxu0 %v792_v10  ;;  %v744_v52 = vmax.f32 %v704_v13, 0.0  ;;  %v780_v56 = vpack.c.bf16 %v743_v50, %v739_v4  ;;  %v785_v53 = vpack.c.bf16 %v752_v0, %v748_v5  ;;  %v738_v62 = vmax.f32 %v627_v22, 0.0  ;;  %v822_v45 = vpop.permute.xlu1 %821 }
 0x205   : > { %957 = vmatprep.subr.bf16.mxu1 %v794_v44  ;;  %885 = vmatpush1.bf16.msra.mxu0 %v791_v43  ;;  %v782_v59 = vpack.c.bf16 %v745_v47, %v741_v46  ;;  %v740_v26 = vmax.f32 %v700_v2, 0.0  ;;  %v827_v16 = vpop.permute.xlu0 %826 }
 0x206   : > { %958 = vmatpush1.bf16.msra.mxu1 %v793_v41  ;;  %886 = vmatprep.subr.bf16.mxu0 %v788_v11  ;;  %v779_v57 = vpack.c.bf16 %v742_v34, %v738_v62 }
 0x207   : > { %959 = vmatprep.subr.bf16.mxu1 %v790_v23  ;;  %v781_v39 = vpack.c.bf16 %v744_v52, %v740_v26 }
 0x208   : > { %v2326_v13 = vpop.permute.xlu1 %811 }
 0x209   : > { %887 = vmatpush1.bf16.msra.mxu0 %v787_v38  ;;  %v2322_v11 = vpop.permute.xlu0 %816 }
 0x20a   : > { %960 = vmatpush1.bf16.msra.mxu1 %v789_v14  ;;  %888 = vmatprep.subr.bf16.mxu0 %v784_v58 }
 0x20b   : > { %961 = vmatprep.subr.bf16.mxu1 %v786_v33 }
 0x20d   : > { %889 = vmatpush1.bf16.msra.mxu0 %v783_v48  ;;  %v2324_v49 = vpop.permute.xlu0 %806 }
 0x20e   : > { %962 = vmatpush1.bf16.msra.mxu1 %v785_v53  ;;  %890 = vmatprep.subr.bf16.mxu0 %v780_v56 }
 0x20f   : > { %963 = vmatprep.subr.bf16.mxu1 %v782_v59 }
 0x211   : > { %891 = vmatpush1.bf16.msra.mxu0 %v779_v57 }
 0x212   : > { %964 = vmatpush1.bf16.msra.mxu1 %v781_v39 }
 0x214   : > { %1708 = vmatmul.mubr.msk.bf16.vlgmr.msra.gmra.mxu0 %vm579_vm1, %v1829_v40 }
 0x215   : > { %1712 = vmatmul.mubr.msk.bf16.vlgmr.msra.gmra.mxu1 %vm579_vm1, %v1829_v40  ;;  %918 = vmatprep.mubr.bf16.mxu0 %v1903_v8 }
 0x216   : > { %991 = vmatprep.mubr.bf16.mxu1 %v1903_v8 }
 0x21c   : > { %1709 = vmatmul.mubr.msk.bf16.gmra.mxu0 %vm579_vm1, %v1830_v42 }
 0x21d   : > { %1713 = vmatmul.mubr.msk.bf16.gmra.mxu1 %vm579_vm1, %v1830_v42  ;;  %928 = vmatprep.mubr.bf16.mxu0 %v1903_v8 }
 0x21e   : > { %1001 = vmatprep.mubr.bf16.mxu1 %v1903_v8 }
 0x224   : > { %1710 = vmatmul.mubr.msk.bf16.gmra.mxu0 %vm579_vm1, %v1831_v29 }
 0x225   : > { %1714 = vmatmul.mubr.msk.bf16.gmra.mxu1 %vm579_vm1, %v1831_v29  ;;  %938 = vmatprep.mubr.bf16.mxu0 %v1903_v8 }
 0x226   : > { %1011 = vmatprep.mubr.bf16.mxu1 %v1903_v8 }
 0x22c   : > { %1711 = vmatmul.mubr.msk.bf16.gmra.mxu0 %vm579_vm1, %v1832_v30 }
 0x22d   : > { %1715 = vmatmul.mubr.msk.bf16.gmra.mxu1 %vm579_vm1, %v1832_v30  ;;  %1192 = vmatprep.mubr.bf16.mxu0 %v1903_v8 }
 0x22e   : > { %1265 = vmatprep.mubr.bf16.mxu1 %v1903_v8 }
 0x2d4   : > { %v2310_v54 = vpop.f32.mrf.mxu0 }
 0x2d5   : > { %v2312_v55 = vpop.f32.mrf.mxu1 }
 0x2d6   : > { %v912_v60 = vpop.f32.mrf.mxu0 }
 0x2d7   : > { %v985_v61 = vpop.f32.mrf.mxu1  ;;  %v2329_v63 = vadd.f32 %v912_v60, %v2324_v49 }
 0x2d8   : > { %v2314_v6 = vpop.f32.mrf.mxu0  ;;  %v2332_v35 = vadd.f32 %v985_v61, %v2324_v49 }
 0x2d9   : > { %v2316_v9 = vpop.f32.mrf.mxu1 }
 0x2da   : > { %v916_v15 = vpop.f32.mrf.mxu0 }
 0x2db   : > { %v989_v17 = vpop.f32.mrf.mxu1  ;;  %v2335_v50 = vadd.f32 %v916_v15, %v2326_v13 }
 0x2dc   : > { %v2318_v24 = vpop.f32.mrf.mxu0  ;;  %v2338_v0 = vadd.f32 %v989_v17, %v2326_v13 }
 0x2dd   : > { %v2320_v25 = vpop.f32.mrf.mxu1 }
 0x2de   : > { %v922_v21 = vpop.f32.mrf.mxu0 }
 0x2df   : > { %v995_v31 = vpop.f32.mrf.mxu1  ;;  %v2341_v58 = vadd.f32 %v922_v21, %v2322_v11 }
 0x2e0   : > { %v924_v3 = vpop.f32.mrf.mxu0  ;;  %v2344_v14 = vadd.f32 %v995_v31, %v2322_v11 }
 0x2e1   : > { %v997_v10 = vpop.f32.mrf.mxu1  ;;  %v2346_v47 = vadd.f32 %v924_v3, %v822_v45 }
 0x2e2   : > { %v926_v7 = vpop.f32.mrf.mxu0  ;;  %v2348_v51 = vadd.f32 %v997_v10, %v822_v45 }
 0x2e3   : > { %v999_v43 = vpop.f32.mrf.mxu1  ;;  %v2350_v33 = vadd.f32 %v926_v7, %v822_v45 }
 0x2e4   : > { %v930_v44 = vpop.f32.mrf.mxu0  ;;  %v2352_v2 = vadd.f32 %v999_v43, %v822_v45 }
 0x2e5   : > { %v1003_v1 = vpop.f32.mrf.mxu1  ;;  %v931_v5 = vadd.f32 %v930_v44, %v827_v16 }
 0x2e6   : > { %v932_v36 = vpop.f32.mrf.mxu0  ;;  %v1004_v45 = vadd.f32 %v1003_v1, %v827_v16  ;;  %v915_v1 = vadd.f32 %v2314_v6, %v2326_v13  ;;  %v1036_v6 = vmax.f32 %v2348_v51, 0.0 }
 0x2e7   : > { %v1005_v41 = vpop.f32.mrf.mxu1  ;;  %v933_v57 = vadd.f32 %v932_v36, %v827_v16 }
 0x2e8   : > { %v934_v18 = vpop.f32.mrf.mxu0  ;;  %v1006_v39 = vadd.f32 %v1005_v41, %v827_v16 }
 0x2e9   : > { %v1007_v28 = vpop.f32.mrf.mxu1  ;;  %v935_v30 = vadd.f32 %v934_v18, %v832_v27 }
 0x2ea   : > { %v936_v23 = vpop.f32.mrf.mxu0  ;;  %v1008_v60 = vadd.f32 %v1007_v28, %v832_v27  ;;  %v1041_v41 = vmax.f32 %v1006_v39, 0.0 }
 0x2eb   : > { %v1009_v12 = vpop.f32.mrf.mxu1  ;;  %v937_v46 = vadd.f32 %v936_v23, %v832_v27  ;;  %v1039_v23 = vmax.f32 %v933_v57, 0.0 }
 0x2ec   : > { %v940_v32 = vpop.f32.mrf.mxu0  ;;  %v1010_v56 = vadd.f32 %v1009_v12, %v832_v27  ;;  %v1035_v27 = vmax.f32 %v2350_v33, 0.0  ;;  %v1044_v18 = vmax.f32 %v1008_v60, 0.0  ;;  %v1031_v33 = vmax.f32 %v2341_v58, 0.0 }
 0x2ed   : > { %v1013_v37 = vpop.f32.mrf.mxu1  ;;  %v941_v53 = vadd.f32 %v940_v32, %v837_v20  ;;  %v1043_v17 = vmax.f32 %v937_v46, 0.0  ;;  %v994_v46 = vadd.f32 %v2320_v25, %v2322_v11  ;;  %v1029_v58 = vmax.f32 %v2338_v0, 0.0 }
 0x2ee   : > { %v942_v38 = vpop.f32.mrf.mxu0  ;;  %v1014_v40 = vadd.f32 %v1013_v37, %v837_v20  ;;  %v1045_v10 = vmax.f32 %v1010_v56, 0.0  ;;  %v1068_v56 = vpack.c.bf16 %v1035_v27, %v1031_v33 }
 0x2ef   : > { %v1015_v22 = vpop.f32.mrf.mxu1  ;;  %v943_v34 = vadd.f32 %v942_v38, %v837_v20  ;;  %v1046_v7 = vmax.f32 %v941_v53, 0.0  ;;  %v921_v38 = vadd.f32 %v2318_v24, %v2322_v11  ;;  %v988_v24 = vadd.f32 %v2316_v9, %v2326_v13 }
 0x2f0   : > { %v944_v4 = vpop.f32.mrf.mxu0  ;;  %v1016_v62 = vadd.f32 %v1015_v22, %v837_v20  ;;  %v1048_v12 = vmax.f32 %v1014_v40, 0.0  ;;  %v1042_v20 = vmax.f32 %v935_v30, 0.0  ;;  %v1037_v22 = vmax.f32 %v2352_v2, 0.0  ;;  %v1835_v40 = vld [vmem:[%s2546_s1 + $0x70] sm:$0xff]  }
 0x2f1   : > { %v945_v48 = vadd.f32 %v944_v4, %v842_v19  ;;  %v1017_v52 = vpop.f32.mrf.mxu1  ;;  %v1047_v21 = vmax.f32 %v943_v34, 0.0  ;;  %v1038_v4 = vmax.f32 %v931_v5, 0.0  ;;  %v1074_v16 = vpack.c.bf16 %v1045_v10, %v1041_v41  ;;  %v1126_v10 = vpop.permute.xlu1 %1125 }
 0x2f2   : > { %v1018_v59 = vadd.f32 %v1017_v52, %v842_v19  ;;  %v946_v26 = vpop.f32.mrf.mxu0  ;;  %v1049_v43 = vmax.f32 %v1016_v62, 0.0  ;;  %v1040_v34 = vmax.f32 %v1004_v45, 0.0  ;;  %v1033_v2 = vmax.f32 %v2344_v14, 0.0 }
 0x2f3   : > { %v947_v42 = vadd.f32 %v946_v26, %v842_v19  ;;  %v1019_v29 = vpop.f32.mrf.mxu1  ;;  %v1050_v61 = vmax.f32 %v945_v48, 0.0  ;;  %v1034_v5 = vmax.f32 %v2346_v47, 0.0  ;;  %v1071_v48 = vpack.c.bf16 %v1042_v20, %v1038_v4 }
 0x2f4   : > { %v1020_v15 = vadd.f32 %v1019_v29, %v842_v19  ;;  %v1052_v31 = vmax.f32 %v1018_v59, 0.0  ;;  %v1072_v19 = vpack.c.bf16 %v1043_v17, %v1039_v23  ;;  %v1027_v52 = vmax.f32 %v2335_v50, 0.0 }
 0x2f5   : > { %v1051_v3 = vmax.f32 %v947_v42, 0.0  ;;  %v1075_v32 = vpack.c.bf16 %v1050_v61, %v1046_v7  ;;  %v1073_v25 = vpack.c.bf16 %v1044_v18, %v1040_v34  ;;  %v911_v11 = vadd.f32 %v2310_v54, %v2324_v49  ;;  %v1836_v42 = vld [vmem:[%s2546_s1 + $0x78] sm:$0xff]   ;;  %v1116_v41 = vpop.permute.xlu1 %1115 }
 0x2f6   : > { %v1053_v44 = vmax.f32 %v1020_v15, 0.0  ;;  %v1077_v28 = vpack.c.bf16 %v1052_v31, %v1048_v12  ;;  %v1030_v53 = vmax.f32 %v921_v38, 0.0  ;;  %v1070_v62 = vpack.c.bf16 %v1037_v22, %v1033_v2  ;;  %v1121_v31 = vpop.permute.xlu0 %1120 }
 0x2f7   : > { %v1076_v36 = vpack.c.bf16 %v1051_v3, %v1047_v21  ;;  %v984_v9 = vadd.f32 %v2312_v55, %v2324_v49  ;;  %v1023_v13 = vmax.f32 %v2329_v63, 0.0  ;;  %v1032_v14 = vmax.f32 %v994_v46, 0.0  ;;  %v1833_v63 = vld [vmem:[%s2546_s1 + $0x60] sm:$0xff]  }
 0x2f8   : > { %v1078_v37 = vpack.c.bf16 %v1053_v44, %v1049_v43  ;;  %v1025_v50 = vmax.f32 %v2332_v35, 0.0  ;;  %v1026_v47 = vmax.f32 %v915_v1, 0.0  ;;  %v1067_v51 = vpack.c.bf16 %v1034_v5, %v1030_v53  ;;  %v1834_v35 = vld [vmem:[%s2546_s1 + $0x68] sm:$0xff]  }
 0x2f9   : > { %1168 = vmatprep.subr.bf16.mxu0 %v1076_v36  ;;  %v1028_v59 = vmax.f32 %v988_v24, 0.0  ;;  %v1064_v54 = vpack.c.bf16 %v1027_v52, %v1023_v13  ;;  %v1069_v26 = vpack.c.bf16 %v1036_v6, %v1032_v14  ;;  %v1022_v0 = vmax.f32 %v911_v11, 0.0  ;;  %v1106_v38 = vpop.permute.xlu1 %1105 }
 0x2fa   : > { %1241 = vmatprep.subr.bf16.mxu1 %v1078_v37  ;;  %1169 = vmatpush1.bf16.msra.mxu0 %v1075_v32  ;;  %v1066_v57 = vpack.c.bf16 %v1029_v58, %v1025_v50  ;;  %v1024_v39 = vmax.f32 %v984_v9, 0.0  ;;  %v1111_v12 = vpop.permute.xlu0 %1110 }
 0x2fb   : > { %1242 = vmatpush1.bf16.msra.mxu1 %v1077_v28  ;;  %1170 = vmatprep.subr.bf16.mxu0 %v1072_v19  ;;  %v1063_v55 = vpack.c.bf16 %v1026_v47, %v1022_v0 }
 0x2fc   : > { %1243 = vmatprep.subr.bf16.mxu1 %v1074_v16  ;;  %v1065_v49 = vpack.c.bf16 %v1028_v59, %v1024_v39 }
 0x2fd   : > { %v2420_v24 = vpop.permute.xlu1 %1095 }
 0x2fe   : > { %1171 = vmatpush1.bf16.msra.mxu0 %v1071_v48  ;;  %v2416_v19 = vpop.permute.xlu0 %1100 }
 0x2ff   : > { %1244 = vmatpush1.bf16.msra.mxu1 %v1073_v25  ;;  %1172 = vmatprep.subr.bf16.mxu0 %v1068_v56 }
 0x300   : > { %1245 = vmatprep.subr.bf16.mxu1 %v1070_v62 }
 0x302   : > { %1173 = vmatpush1.bf16.msra.mxu0 %v1067_v51  ;;  %v2418_v33 = vpop.permute.xlu0 %1090 }
 0x303   : > { %1246 = vmatpush1.bf16.msra.mxu1 %v1069_v26  ;;  %1174 = vmatprep.subr.bf16.mxu0 %v1064_v54 }
 0x304   : > { %1247 = vmatprep.subr.bf16.mxu1 %v1066_v57 }
 0x306   : > { %1175 = vmatpush1.bf16.msra.mxu0 %v1063_v55 }
 0x307   : > { %1248 = vmatpush1.bf16.msra.mxu1 %v1065_v49 }
 0x309   : > { %1736 = vmatmul.mubr.msk.bf16.vlgmr.msra.gmra.mxu0 %vm579_vm1, %v1833_v63 }
 0x30a   : > { %1740 = vmatmul.mubr.msk.bf16.vlgmr.msra.gmra.mxu1 %vm579_vm1, %v1833_v63  ;;  %1202 = vmatprep.mubr.bf16.mxu0 %v1903_v8 }
 0x30b   : > { %1275 = vmatprep.mubr.bf16.mxu1 %v1903_v8 }
 0x311   : > { %1737 = vmatmul.mubr.msk.bf16.gmra.mxu0 %vm579_vm1, %v1834_v35 }
 0x312   : > { %1741 = vmatmul.mubr.msk.bf16.gmra.mxu1 %vm579_vm1, %v1834_v35  ;;  %1212 = vmatprep.mubr.bf16.mxu0 %v1903_v8 }
 0x313   : > { %1285 = vmatprep.mubr.bf16.mxu1 %v1903_v8 }
 0x319   : > { %1738 = vmatmul.mubr.msk.bf16.gmra.mxu0 %vm579_vm1, %v1835_v40 }
 0x31a   : > { %1742 = vmatmul.mubr.msk.bf16.gmra.mxu1 %vm579_vm1, %v1835_v40  ;;  %1222 = vmatprep.mubr.bf16.mxu0 %v1903_v8 }
 0x31b   : > { %1295 = vmatprep.mubr.bf16.mxu1 %v1903_v8 }
 0x321   : > { %1739 = vmatmul.mubr.msk.bf16.gmra.mxu0 %vm579_vm1, %v1836_v42 }
 0x322   : > { %1743 = vmatmul.mubr.msk.bf16.gmra.mxu1 %vm579_vm1, %v1836_v42  ;;  %1469 = vmatprep.mubr.bf16.mxu0 %v1903_v8 }
 0x323   : > { %1528 = vmatprep.mubr.bf16.mxu1 %v1903_v8 }
 0x3c9   : > { %v2404_v29 = vpop.f32.mrf.mxu0 }
 0x3ca   : > { %v2406_v30 = vpop.f32.mrf.mxu1 }
 0x3cb   : > { %v1196_v60 = vpop.f32.mrf.mxu0 }
 0x3cc   : > { %v1269_v61 = vpop.f32.mrf.mxu1  ;;  %v2423_v2 = vadd.f32 %v1196_v60, %v2418_v33 }
 0x3cd   : > { %v2408_v15 = vpop.f32.mrf.mxu0  ;;  %v2426_v5 = vadd.f32 %v1269_v61, %v2418_v33 }
 0x3ce   : > { %v2410_v17 = vpop.f32.mrf.mxu1 }
 0x3cf   : > { %v1200_v21 = vpop.f32.mrf.mxu0 }
 0x3d0   : > { %v1273_v3 = vpop.f32.mrf.mxu1  ;;  %v2429_v52 = vadd.f32 %v1200_v21, %v2420_v24 }
 0x3d1   : > { %v2412_v7 = vpop.f32.mrf.mxu0  ;;  %v2432_v6 = vadd.f32 %v1273_v3, %v2420_v24 }
 0x3d2   : > { %v2414_v43 = vpop.f32.mrf.mxu1 }
 0x3d3   : > { %v1206_v44 = vpop.f32.mrf.mxu0 }
 0x3d4   : > { %v1279_v45 = vpop.f32.mrf.mxu1  ;;  %v2435_v56 = vadd.f32 %v1206_v44, %v2416_v19 }
 0x3d5   : > { %v1208_v23 = vpop.f32.mrf.mxu0  ;;  %v2438_v25 = vadd.f32 %v1279_v45, %v2416_v19 }
 0x3d6   : > { %v1281_v36 = vpop.f32.mrf.mxu1  ;;  %v2440_v58 = vadd.f32 %v1208_v23, %v1106_v38 }
 0x3d7   : > { %v1210_v20 = vpop.f32.mrf.mxu0  ;;  %v2442_v53 = vadd.f32 %v1281_v36, %v1106_v38 }
 0x3d8   : > { %v1283_v32 = vpop.f32.mrf.mxu1  ;;  %v2444_v62 = vadd.f32 %v1210_v20, %v1106_v38 }
 0x3d9   : > { %v1214_v37 = vpop.f32.mrf.mxu0  ;;  %v2446_v9 = vadd.f32 %v1283_v32, %v1106_v38 }
 0x3da   : > { %v1287_v27 = vpop.f32.mrf.mxu1  ;;  %v1215_v14 = vadd.f32 %v1214_v37, %v1111_v12 }
 0x3db   : > { %v1216_v18 = vpop.f32.mrf.mxu0  ;;  %v1288_v38 = vadd.f32 %v1287_v27, %v1111_v12  ;;  %v1199_v27 = vadd.f32 %v2408_v15, %v2420_v24  ;;  %v1320_v15 = vmax.f32 %v2442_v53, 0.0 }
 0x3dc   : > { %v1289_v28 = vpop.f32.mrf.mxu1  ;;  %v1217_v55 = vadd.f32 %v1216_v18, %v1111_v12 }
 0x3dd   : > { %v1218_v22 = vpop.f32.mrf.mxu0  ;;  %v1290_v49 = vadd.f32 %v1289_v28, %v1111_v12 }
 0x3de   : > { %v1291_v4 = vpop.f32.mrf.mxu1  ;;  %v1219_v42 = vadd.f32 %v1218_v22, %v1116_v41 }
 0x3df   : > { %v1220_v16 = vpop.f32.mrf.mxu0  ;;  %v1292_v60 = vadd.f32 %v1291_v4, %v1116_v41  ;;  %v1325_v28 = vmax.f32 %v1290_v49, 0.0 }
 0x3e0   : > { %v1293_v1 = vpop.f32.mrf.mxu1  ;;  %v1221_v50 = vadd.f32 %v1220_v16, %v1116_v41  ;;  %v1323_v16 = vmax.f32 %v1217_v55, 0.0 }
 0x3e1   : > { %v1224_v46 = vpop.f32.mrf.mxu0  ;;  %v1294_v54 = vadd.f32 %v1293_v1, %v1116_v41  ;;  %v1319_v41 = vmax.f32 %v2444_v62, 0.0  ;;  %v1328_v22 = vmax.f32 %v1292_v60, 0.0  ;;  %v1315_v62 = vmax.f32 %v2435_v56, 0.0 }
 0x3e2   : > { %v1297_v34 = vpop.f32.mrf.mxu1  ;;  %v1225_v26 = vadd.f32 %v1224_v46, %v1121_v31  ;;  %v1327_v3 = vmax.f32 %v1221_v50, 0.0  ;;  %v1278_v50 = vadd.f32 %v2414_v43, %v2416_v19  ;;  %v1313_v56 = vmax.f32 %v2432_v6, 0.0 }
 0x3e3   : > { %v1226_v48 = vpop.f32.mrf.mxu0  ;;  %v1298_v63 = vadd.f32 %v1297_v34, %v1121_v31  ;;  %v1329_v36 = vmax.f32 %v1294_v54, 0.0  ;;  %v1352_v54 = vpack.c.bf16 %v1319_v41, %v1315_v62 }
 0x3e4   : > { %v1299_v11 = vpop.f32.mrf.mxu1  ;;  %v1227_v47 = vadd.f32 %v1226_v48, %v1121_v31  ;;  %v1330_v20 = vmax.f32 %v1225_v26, 0.0  ;;  %v1205_v48 = vadd.f32 %v2412_v7, %v2416_v19  ;;  %v1272_v7 = vadd.f32 %v2410_v17, %v2420_v24 }
 0x3e5   : > { %v1228_v13 = vpop.f32.mrf.mxu0  ;;  %v1300_v0 = vadd.f32 %v1299_v11, %v1121_v31  ;;  %v1332_v1 = vmax.f32 %v1298_v63, 0.0  ;;  %v1326_v31 = vmax.f32 %v1219_v42, 0.0  ;;  %v1321_v11 = vmax.f32 %v2446_v9, 0.0  ;;  %v1839_v63 = vld [vmem:[%s2546_s1 + $0x90] sm:$0xff]  }
 0x3e6   : > { %v1229_v51 = vadd.f32 %v1228_v13, %v1126_v10  ;;  %v1301_v59 = vpop.f32.mrf.mxu1  ;;  %v1331_v44 = vmax.f32 %v1227_v47, 0.0  ;;  %v1322_v13 = vmax.f32 %v1215_v14, 0.0  ;;  %v1358_v12 = vpack.c.bf16 %v1329_v36, %v1325_v28 }
 0x3e7   : > { %v1302_v57 = vadd.f32 %v1301_v59, %v1126_v10  ;;  %v1230_v39 = vpop.f32.mrf.mxu0  ;;  %v1333_v32 = vmax.f32 %v1300_v0, 0.0  ;;  %v1324_v47 = vmax.f32 %v1288_v38, 0.0  ;;  %v1317_v9 = vmax.f32 %v2438_v25, 0.0 }
 0x3e8   : > { %v1231_v35 = vadd.f32 %v1230_v39, %v1126_v10  ;;  %v1303_v40 = vpop.f32.mrf.mxu1  ;;  %v1334_v61 = vmax.f32 %v1229_v51, 0.0  ;;  %v1318_v14 = vmax.f32 %v2440_v58, 0.0  ;;  %v1355_v51 = vpack.c.bf16 %v1326_v31, %v1322_v13 }
 0x3e9   : > { %v1304_v21 = vadd.f32 %v1303_v40, %v1126_v10  ;;  %v1336_v45 = vmax.f32 %v1302_v57, 0.0  ;;  %v1356_v10 = vpack.c.bf16 %v1327_v3, %v1323_v16  ;;  %v1311_v59 = vmax.f32 %v2429_v52, 0.0  ;;  %v1375_v40 = vpop.permute.xlu0 %1374 }
 0x3ea   : > { %v1335_v23 = vmax.f32 %v1231_v35, 0.0  ;;  %v1359_v46 = vpack.c.bf16 %v1334_v61, %v1330_v20  ;;  %v1357_v43 = vpack.c.bf16 %v1328_v22, %v1324_v47  ;;  %v1195_v19 = vadd.f32 %v2404_v29, %v2418_v33  ;;  %v1840_v35 = vld [vmem:[%s2546_s1 + $0x98] sm:$0xff]  }
 0x3eb   : > { %v1337_v37 = vmax.f32 %v1304_v21, 0.0  ;;  %v1361_v4 = vpack.c.bf16 %v1336_v45, %v1332_v1  ;;  %v1314_v26 = vmax.f32 %v1205_v48, 0.0  ;;  %v1354_v0 = vpack.c.bf16 %v1321_v11, %v1317_v9 }
 0x3ec   : > { %v1360_v18 = vpack.c.bf16 %v1335_v23, %v1331_v44  ;;  %v1268_v17 = vadd.f32 %v2406_v30, %v2418_v33  ;;  %v1307_v24 = vmax.f32 %v2423_v2, 0.0  ;;  %v1316_v25 = vmax.f32 %v1278_v50, 0.0  ;;  %v1837_v2 = vld [vmem:[%s2546_s1 + $0x80] sm:$0xff]  }
 0x3ed   : > { %v1362_v34 = vpack.c.bf16 %v1337_v37, %v1333_v32  ;;  %v1309_v52 = vmax.f32 %v2426_v5, 0.0  ;;  %v1310_v58 = vmax.f32 %v1199_v27, 0.0  ;;  %v1351_v53 = vpack.c.bf16 %v1318_v14, %v1314_v26  ;;  %v1838_v5 = vld [vmem:[%s2546_s1 + $0x88] sm:$0xff]  }
 0x3ee   : > { %1445 = vmatprep.subr.bf16.mxu0 %v1360_v18  ;;  %v1312_v57 = vmax.f32 %v1272_v7, 0.0  ;;  %v1348_v29 = vpack.c.bf16 %v1311_v59, %v1307_v24  ;;  %v1353_v39 = vpack.c.bf16 %v1320_v15, %v1316_v25  ;;  %v1306_v6 = vmax.f32 %v1195_v19, 0.0 }
 0x3ef   : > { %1504 = vmatprep.subr.bf16.mxu1 %v1362_v34  ;;  %1446 = vmatpush1.bf16.msra.mxu0 %v1359_v46  ;;  %v1350_v55 = vpack.c.bf16 %v1313_v56, %v1309_v52  ;;  %v1308_v49 = vmax.f32 %v1268_v17, 0.0 }
 0x3f0   : > { %1505 = vmatpush1.bf16.msra.mxu1 %v1361_v4  ;;  %1447 = vmatprep.subr.bf16.mxu0 %v1356_v10  ;;  %v1347_v30 = vpack.c.bf16 %v1310_v58, %v1306_v6 }
 0x3f1   : > { %1506 = vmatprep.subr.bf16.mxu1 %v1358_v12  ;;  %v1349_v33 = vpack.c.bf16 %v1312_v57, %v1308_v49 }
 0x3f3   : > { %1448 = vmatpush1.bf16.msra.mxu0 %v1355_v51 }
 0x3f4   : > { %1507 = vmatpush1.bf16.msra.mxu1 %v1357_v43  ;;  %1449 = vmatprep.subr.bf16.mxu0 %v1352_v54 }
 0x3f5   : > { %1508 = vmatprep.subr.bf16.mxu1 %v1354_v0 }
 0x3f7   : > { %1450 = vmatpush1.bf16.msra.mxu0 %v1351_v53 }
 0x3f8   : > { %1509 = vmatpush1.bf16.msra.mxu1 %v1353_v39  ;;  %1451 = vmatprep.subr.bf16.mxu0 %v1348_v29 }
 0x3f9   : > { %1510 = vmatprep.subr.bf16.mxu1 %v1350_v55 }
 0x3fb   : > { %1452 = vmatpush1.bf16.msra.mxu0 %v1347_v30 }
 0x3fc   : > { %1511 = vmatpush1.bf16.msra.mxu1 %v1349_v33 }
 0x3fe   : > { %1764 = vmatmul.mubr.msk.bf16.vlgmr.msra.gmra.mxu0 %vm579_vm1, %v1837_v2 }
 0x3ff   : > { %1768 = vmatmul.mubr.msk.bf16.vlgmr.msra.gmra.mxu1 %vm579_vm1, %v1837_v2  ;;  %1477 = vmatprep.mubr.bf16.mxu0 %v1903_v8 }
 0x400   : > { %1536 = vmatprep.mubr.bf16.mxu1 %v1903_v8 }
 0x406   : > { %1765 = vmatmul.mubr.msk.bf16.gmra.mxu0 %vm579_vm1, %v1838_v5 }
 0x407   : > { %1769 = vmatmul.mubr.msk.bf16.gmra.mxu1 %vm579_vm1, %v1838_v5  ;;  %1483 = vmatprep.mubr.bf16.mxu0 %v1903_v8 }
 0x408   : > { %1542 = vmatprep.mubr.bf16.mxu1 %v1903_v8 }
 0x40e   : > { %1766 = vmatmul.mubr.msk.bf16.gmra.mxu0 %vm579_vm1, %v1839_v63 }
 0x40f   : > { %1770 = vmatmul.mubr.msk.bf16.gmra.mxu1 %vm579_vm1, %v1839_v63  ;;  %1489 = vmatprep.mubr.bf16.mxu0 %v1903_v8 }
 0x410   : > { %1548 = vmatprep.mubr.bf16.mxu1 %v1903_v8 }
 0x416   : > { %1767 = vmatmul.mubr.msk.bf16.gmra.mxu0 %vm579_vm1, %v1840_v35 }
 0x417   : > { %1771 = vmatmul.mubr.msk.bf16.gmra.mxu1 %vm579_vm1, %v1840_v35 }
 0x4be   : > { %v1471_v42 = vpop.f32.mrf.mxu0 }
 0x4bf   : > { %v1472_v60 = vadd.f32 %v1471_v42, %v1375_v40  ;;  %v1530_v61 = vpop.f32.mrf.mxu1 }
 0x4c0   : > { %v1531_v21 = vadd.f32 %v1530_v61, %v1375_v40  ;;  %v1473_v8 = vpop.f32.mrf.mxu0 }
 0x4c1   : > { %1555 = vst [vmem:[%s202_s19] sm:$0xff] %v1472_v60  ;;  %v1474_v3 = vadd.f32 %v1473_v8, %v1375_v40  ;;  %v1532_v44 = vpop.f32.mrf.mxu1 }
 0x4c2   : > { %1557 = vst [vmem:[%s202_s19 + $0x10] sm:$0xff] %v1531_v21  ;;  %v1533_v45 = vadd.f32 %v1532_v44, %v1375_v40  ;;  %v1475_v23 = vpop.f32.mrf.mxu0 }
 0x4c3   : > { %1556 = vst [vmem:[%s202_s19 + $0x8] sm:$0xff] %v1474_v3  ;;  %v1534_v36 = vpop.f32.mrf.mxu1 }
 0x4c4   : > { %1558 = vst [vmem:[%s202_s19 + $0x18] sm:$0xff] %v1533_v45  ;;  %v1476_v20 = vpop.f32.mrf.mxu0 }
 0x4c5   : > { %v1535_v32 = vpop.f32.mrf.mxu1 }
 0x4c6   : > { %1854 = shalt.err (!%p1851_p5)
}
 0x4c7   : > { %s1855_s5 = scalar_lea.hbm %s2502_s26, 512  ;;  %s1859_s7 = scalar_lea.hbm %s2548_s3, 1024 }
 0x4c8   : > { %p1856_p7 = scmp.ne.s32.totalorder %s2502_s26, %s1855_s5  ;;  %p1860_p12 = scmp.lt.s32.totalorder %s2502_s26, %s2548_s3 }
 0x4c9   : > { %p1861_p13 = scmp.lt.s32.totalorder %s1859_s7, %s1855_s5 }
 0x4ca   : > { %p1857_p10 = pnand %p1856_p7, %p1963_p6 }
 0x4cb   : > { %p1862_p0 = por %p1861_p13, %p1860_p12 }
 0x4cc   : > { %p1858_p11 = pneg %p1857_p10 }
 0x4ce   : > { %p1863_p1 = pnand %p1862_p0, %p1858_p11 }
 0x4d0   : > { %1866 = shalt.err (!%p1863_p1)
}
 0x4d1   : > { %1779 = dma.vmem_to_hbm [thread:$0]  (%p1963_p6), %s2504_s20, 512, %s2502_s26, %s1560_s16   ;;  %v1479_v37 = vpop.f32.mrf.mxu0  ;;  %v1538_v38 = vpop.f32.mrf.mxu1 }
 0x4d3   : > { %v1480_v16 = vpop.f32.mrf.mxu0  ;;  %v1539_v1 = vpop.f32.mrf.mxu1 }
 0x4d5   : > { %v1481_v18 = vpop.f32.mrf.mxu0  ;;  %v1540_v28 = vpop.f32.mrf.mxu1 }
 0x4d7   : > { %v1482_v31 = vpop.f32.mrf.mxu0  ;;  %v1541_v46 = vpop.f32.mrf.mxu1 }
 0x4d9   : > { %v1485_v34 = vpop.f32.mrf.mxu0  ;;  %v1544_v41 = vpop.f32.mrf.mxu1 }
 0x4db   : > { %v1486_v22 = vpop.f32.mrf.mxu0  ;;  %v1545_v10 = vpop.f32.mrf.mxu1 }
 0x4dd   : > { %v1487_v4 = vpop.f32.mrf.mxu0  ;;  %v1546_v48 = vpop.f32.mrf.mxu1 }
 0x4df   : > { %v1488_v11 = vpop.f32.mrf.mxu0  ;;  %v1547_v13 = vpop.f32.mrf.mxu1 }
 0x4e1   : > { %v1491_v12 = vpop.f32.mrf.mxu0  ;;  %v1550_v27 = vpop.f32.mrf.mxu1 }
 0x4e3   : > { %v1492_v50 = vpop.f32.mrf.mxu0  ;;  %v1551_v62 = vpop.f32.mrf.mxu1 }
 0x4e5   : > { %v1493_v47 = vpop.f32.mrf.mxu0  ;;  %v1552_v7 = vpop.f32.mrf.mxu1 }
 0x4e7   : > { %v1494_v9 = vpop.f32.mrf.mxu0  ;;  %v1553_v14 = vpop.f32.mrf.mxu1 }
 0x4e8 PF: > { %s1586_s22 = sand.u32 1, %s1889_s12   ;;  %p1782_p6 = pnand %p1641_p9, %p1967_p8 }
 0x4e9   : > { %s1587_s10 = scalar_lea.sflag [#allocation4], %s1586_s22 }
 0x4ea   : > { %p1783_p2 = pneg %p1782_p6 }
 0x4ec   : > { %1884 = dma.done.wait (%p1783_p2), %s1587_s10, 512  }
 0x4ed   : > { %1886 = vsyncadd (%p1783_p2), %s1587_s10, 4294966784  ;;  %p13_p3 = scmp.ge.s32.totalorder %s1948_s18, 4   ;;  %s2551_s12 = smov %s1893_s13 }
 0x4ee   : > { %s2552_s13 = smov %s1897_s14  ;;  %s2553_s14 = smov %s1961_s21 }
 0x4ef   : > { %s2554_s15 = smov %s1948_s18  ;;  %15 = sbr.rel (!%p13_p3) target bundleno = 3 (0x3), region = 103 }
 0x4f4   :  { %1592 = vsyncpa [#allocation4], 1 }
 0x4f5   :  { %1594 = vsyncpa [#allocation4 + $0x1], 1 }

</bundles_post_ra>
